<compile_context>
chip_gen: v7x
topology: tpu7x:2x2x1
jax: 0.10.0
libtpu: 0.0.40
codegen_flags: <defaults>
</compile_context>

<pallas_src>
import jax
import jax.numpy as jnp
import numpy as np
from jax.experimental import pallas as pl
from jax.experimental.pallas import tpu as pltpu


def _round_up(a, m):
    return (a + m - 1) // m * m


def _cdiv(a, b):
    return (a + b - 1) // b


# ----------------------------- Pallas kernel ------------------------------ #
def ae_kernel(x_ref,
              w1_ref, b1_ref,      # Conv1d(D -> 16, k=1)            (2DL, 32L)
              w2_ref, b2_ref,      # Conv1d(16 -> 8, k=1)            (32L, 16L)
              w3_ref, b3_ref,      # Conv1d(8 -> 4, k=3, same)       (16L, 8L)
              wz_ref, bz_ref,      # fused Linear(4L->lat)+Linear(lat->L) (8L, 2L)
              wd2_ref, bd2_ref,    # Conv1d(1 -> 8, k=3, same)       (2L, 16L)
              wd3_ref, bd3_ref,    # Conv1d(8 -> 16, k=1)            (16L, 32L)
              wd4_ref, bd4_ref,    # Conv1d(16 -> D, k=1)            (32L, 2DL)
              out_ref):
    bf16, f32 = jnp.bfloat16, jnp.float32

    def dense(h, w_ref, b_ref, relu=True):
        y = jnp.dot(h.astype(bf16), w_ref[...],
                    preferred_element_type=f32) + b_ref[...]
        return jnp.maximum(y, 0.0) if relu else y

    h = x_ref[...]                                 # (TR, 2*D*L)  bf16
    # ---------------- encode ----------------
    h = dense(h, w1_ref, b1_ref)                   # (TR, 2*16L)
    h = dense(h, w2_ref, b2_ref)                   # (TR, 2*8L)
    h = dense(h, w3_ref, b3_ref)                   # (TR, 2*4L)
    # -------- fused latent (We4 @ Wd1) + decode --------
    h = dense(h, wz_ref, bz_ref)                   # (TR, 2*L)   relu(dec1(enc4(h)))
    h = dense(h, wd2_ref, bd2_ref)                 # (TR, 2*8L)
    h = dense(h, wd3_ref, bd3_ref)                 # (TR, 2*16L)
    out_ref[...] = dense(h, wd4_ref, bd4_ref, relu=False)     # (TR, 2*D*L)


# ------------------------------ wrapper ----------------------------------- #
def autoencoder_forward(x, params, latent_dim, *, batch_tile=512):
    """x: (B, D, L) float32. params: dict of PyTorch-shaped arrays."""
    B, D, L = x.shape
    f32, bf16 = jnp.float32, jnp.bfloat16

    # --- layer matrices in the (c*L + l) feature layout (matches torch view) ---
    eye = jnp.eye(L, dtype=f32)
    eye2 = jnp.eye(2, dtype=f32)
    shift = [jnp.eye(L, k=1, dtype=f32), eye, jnp.eye(L, k=-1, dtype=f32)]

    def k1_mat(w):                       # (O, I, 1) -> (I*L, O*L)
        return jnp.kron(w[:, :, 0].T, eye)

    def k3_mat(w):                       # (O, I, 3) -> (I*L, O*L), banded 'same'
        return sum(jnp.kron(w[:, :, k].T, shift[k]) for k in range(3))

    def cbias(b):                        # per-channel conv bias -> per-feature row
        return jnp.repeat(b, L)

    def fold_w(m):                       # (K,N) -> (2K,2N) block-diag, bf16
        return jnp.kron(eye2, m).astype(bf16)

    def fold_b(b_row):                   # (N,) -> (1, 2N) f32
        return jnp.tile(b_row.reshape(1, -1).astype(f32), (1, 2))

    # fused encode_layer4 + decode_layer1 (no ReLU between them in the module)
    wz = params["w4"].T @ params["wd1"].T                    # (4L, L)
    bz = params["b4"] @ params["wd1"].T + params["bd1"]      # (L,)

    weights = [
        fold_w(k1_mat(params["w1"])),  fold_b(cbias(params["b1"])),
        fold_w(k1_mat(params["w2"])),  fold_b(cbias(params["b2"])),
        fold_w(k3_mat(params["w3"])),  fold_b(cbias(params["b3"])),
        fold_w(wz),                    fold_b(bz),
        fold_w(k3_mat(params["wd2"])), fold_b(cbias(params["bd2"])),
        fold_w(k1_mat(params["wd3"])), fold_b(cbias(params["bd3"])),
        fold_w(k1_mat(params["wd4"])), fold_b(cbias(params["bd4"])),
    ]

    # --- pair-fold two samples per row -> lane-dense (R, 2*D*L) slabs ---
    x2 = x.reshape(B, D * L).astype(bf16)            # free reshape, channel-major
    Be = _round_up(B, 2)
    if Be != B:
        x2 = jnp.pad(x2, ((0, Be - B), (0, 0)))
    R = Be // 2
    W = 2 * D * L
    x2 = x2.reshape(R, W)

    # --- batch tiling: even #steps (v7x two-TC split), minimal padding waste ---
    row_tile = max(8, batch_tile // 2)               # rows (= 2 samples) per step
    n_steps = 2 * _cdiv(R, 2 * row_tile)
    TR = _round_up(_cdiv(R, n_steps), 8)
    Rp = _round_up(R, TR)
    if Rp != R:
        x2 = jnp.pad(x2, ((0, Rp - R), (0, 0)))

    in_specs = [pl.BlockSpec((TR, W), lambda b: (b, 0))]
    for w in weights:
        # full-array blocks with constant index_map -> resident, DMA'd once
        in_specs.append(pl.BlockSpec(w.shape, lambda b: (0, 0)))

    layer_kn = [(2 * D * L, 32 * L), (32 * L, 16 * L), (16 * L, 8 * L),
                (8 * L, 2 * L), (2 * L, 16 * L), (16 * L, 32 * L),
                (32 * L, 2 * D * L)]
    flops = 2 * Rp * sum(k * n for k, n in layer_kn)
    weight_bytes = sum(int(np.prod(w.shape)) * int(w.dtype.itemsize)
                       for w in weights)
    bytes_accessed = Rp * W * 2 + Rp * W * 4 + weight_bytes

    out2 = pl.pallas_call(
        ae_kernel,
        out_shape=jax.ShapeDtypeStruct((Rp, W), f32),
        grid=(Rp // TR,),
        in_specs=in_specs,
        out_specs=pl.BlockSpec((TR, W), lambda b: (b, 0)),
        compiler_params=pltpu.CompilerParams(
            dimension_semantics=("parallel",)),
        cost_estimate=pl.CostEstimate(
            flops=int(flops), transcendentals=0,
            bytes_accessed=int(bytes_accessed)),
    )(x2, *weights)

    # unfold pairs, strip padding, back to (B, D, L) -- all free reshapes
    return out2.reshape(2 * Rp, D * L)[:B].reshape(B, D, L)


# --------------------------- reference (pure JAX) -------------------------- #
def reference_forward(x, p, latent_dim):
    B, D, L = x.shape

    def pw(h, w, b):   # kernel-size-1 conv
        return jnp.einsum("oi,bil->bol", w[:, :, 0], h) + b[None, :, None]

    def k3(h, w, b):   # kernel-size-3 'same' conv
        hp = jnp.pad(h, ((0, 0), (0, 0), (1, 1)))
        out = sum(jnp.einsum("oi,bil->bol", w[:, :, k], hp[:, :, k:k + L])
                  for k in range(3))
        return out + b[None, :, None]

    h = jax.nn.relu(pw(x, p["w1"], p["b1"]))
    h = jax.nn.relu(pw(h, p["w2"], p["b2"]))
    h = jax.nn.relu(k3(h, p["w3"], p["b3"]))
    z = h.reshape(B, 4 * L)
    lat = z @ p["w4"].T + p["b4"]
    d = jax.nn.relu(lat @ p["wd1"].T + p["bd1"])[:, None, :]
    d = jax.nn.relu(k3(d, p["wd2"], p["bd2"]))
    d = jax.nn.relu(pw(d, p["wd3"], p["bd3"]))
    return pw(d, p["wd4"], p["bd4"])


# ------------------------------- params ----------------------------------- #
def init_params(key, input_dim, input_len, latent_dim):
    def u(key, shape, fan_in):
        bound = 1.0 / np.sqrt(fan_in)
        return jax.random.uniform(key, shape, jnp.float32, -bound, bound)

    keys = jax.random.split(key, 16)
    L = input_len
    return {
        "w1": u(keys[0], (16, input_dim, 1), input_dim),
        "b1": u(keys[1], (16,), input_dim),
        "w2": u(keys[2], (8, 16, 1), 16),
        "b2": u(keys[3], (8,), 16),
        "w3": u(keys[4], (4, 8, 3), 8 * 3),
        "b3": u(keys[5], (4,), 8 * 3),
        "w4": u(keys[6], (latent_dim, 4 * L), 4 * L),
        "b4": u(keys[7], (latent_dim,), 4 * L),
        "wd1": u(keys[8], (L, latent_dim), latent_dim),
        "bd1": u(keys[9], (L,), latent_dim),
        "wd2": u(keys[10], (8, 1, 3), 1 * 3),
        "bd2": u(keys[11], (8,), 1 * 3),
        "wd3": u(keys[12], (16, 8, 1), 8),
        "bd3": u(keys[13], (16,), 8),
        "wd4": u(keys[14], (input_dim, 16, 1), 16),
        "bd4": u(keys[15], (input_dim,), 16),
    }
    # TODO(synk): estimator_layer (Linear(latent -> target_num)) exists in the
    # module but is not used by forward(); omitted from the kernel.


if __name__ == "__main__":
    B, INPUT_DIM, INPUT_LEN, LATENT_DIM = 2, 4, 16, 8

    key = jax.random.PRNGKey(0)
    kx, kp = jax.random.split(key)
    x = jax.random.normal(kx, (B, INPUT_DIM, INPUT_LEN), jnp.float32)
    params = init_params(kp, INPUT_DIM, INPUT_LEN, LATENT_DIM)

    out = autoencoder_forward(x, params, LATENT_DIM)
    out = jax.block_until_ready(out)

    ref = reference_forward(x, params, LATENT_DIM)
    # bf16 MXU matmuls: tolerance loosened per the perf review
    np.testing.assert_allclose(np.asarray(out), np.asarray(ref),
                               rtol=5e-2, atol=5e-2)
    assert out.shape == (B, INPUT_DIM, INPUT_LEN)
    print("KERNEL_OK")
</pallas_src>

<mosaic_0001>
module attributes {stable_mosaic.version = 11 : i64} {
  func.func @ae_kernel(%arg0: i32, %arg1: memref<8x128xbf16, #tpu.memory_space<vmem>>, %arg2: memref<128x512xbf16, #tpu.memory_space<vmem>>, %arg3: memref<1x512xf32, #tpu.memory_space<vmem>>, %arg4: memref<512x256xbf16, #tpu.memory_space<vmem>>, %arg5: memref<1x256xf32, #tpu.memory_space<vmem>>, %arg6: memref<256x128xbf16, #tpu.memory_space<vmem>>, %arg7: memref<1x128xf32, #tpu.memory_space<vmem>>, %arg8: memref<128x32xbf16, #tpu.memory_space<vmem>>, %arg9: memref<1x32xf32, #tpu.memory_space<vmem>>, %arg10: memref<32x256xbf16, #tpu.memory_space<vmem>>, %arg11: memref<1x256xf32, #tpu.memory_space<vmem>>, %arg12: memref<256x512xbf16, #tpu.memory_space<vmem>>, %arg13: memref<1x512xf32, #tpu.memory_space<vmem>>, %arg14: memref<512x128xbf16, #tpu.memory_space<vmem>>, %arg15: memref<1x128xf32, #tpu.memory_space<vmem>>, %arg16: memref<8x128xf32, #tpu.memory_space<vmem>>) attributes {dimension_semantics = [#tpu.dimension_semantics<parallel>], iteration_bounds = array<i64: 1>, scalar_prefetch = 0 : i64, scratch_operands = 0 : i64, tpu.core_type = #tpu.core_type<tc>, window_params = [{transform_indices = @transform_0, window_bounds = array<i64: 8, 128>}, {pipeline_mode = #tpu.pipeline_mode<synchronous>, transform_indices = @transform_1, window_bounds = array<i64: 128, 512>}, {pipeline_mode = #tpu.pipeline_mode<synchronous>, transform_indices = @transform_2, window_bounds = array<i64: 1, 512>}, {pipeline_mode = #tpu.pipeline_mode<synchronous>, transform_indices = @transform_3, window_bounds = array<i64: 512, 256>}, {pipeline_mode = #tpu.pipeline_mode<synchronous>, transform_indices = @transform_4, window_bounds = array<i64: 1, 256>}, {pipeline_mode = #tpu.pipeline_mode<synchronous>, transform_indices = @transform_5, window_bounds = array<i64: 256, 128>}, {pipeline_mode = #tpu.pipeline_mode<synchronous>, transform_indices = @transform_6, window_bounds = array<i64: 1, 128>}, {pipeline_mode = #tpu.pipeline_mode<synchronous>, transform_indices = @transform_7, window_bounds = array<i64: 128, 32>}, {pipeline_mode = #tpu.pipeline_mode<synchronous>, transform_indices = @transform_8, window_bounds = array<i64: 1, 32>}, {pipeline_mode = #tpu.pipeline_mode<synchronous>, transform_indices = @transform_9, window_bounds = array<i64: 32, 256>}, {pipeline_mode = #tpu.pipeline_mode<synchronous>, transform_indices = @transform_10, window_bounds = array<i64: 1, 256>}, {pipeline_mode = #tpu.pipeline_mode<synchronous>, transform_indices = @transform_11, window_bounds = array<i64: 256, 512>}, {pipeline_mode = #tpu.pipeline_mode<synchronous>, transform_indices = @transform_12, window_bounds = array<i64: 1, 512>}, {pipeline_mode = #tpu.pipeline_mode<synchronous>, transform_indices = @transform_13, window_bounds = array<i64: 512, 128>}, {pipeline_mode = #tpu.pipeline_mode<synchronous>, transform_indices = @transform_14, window_bounds = array<i64: 1, 128>}, {transform_indices = @transform_15, window_bounds = array<i64: 8, 128>}]} {
    %c0 = arith.constant 0 : index
    %c0_0 = arith.constant 0 : index
    %0 = vector.load %arg1[%c0, %c0_0] : memref<8x128xbf16, #tpu.memory_space<vmem>>, vector<8x128xbf16>
    %c0_1 = arith.constant 0 : index
    %c0_2 = arith.constant 0 : index
    %1 = vector.load %arg2[%c0_1, %c0_2] : memref<128x512xbf16, #tpu.memory_space<vmem>>, vector<128x512xbf16>
    %cst = arith.constant dense<0.000000e+00> : vector<8x512xf32>
    %2 = tpu.matmul %0, %1, %cst {dimension_numbers = #tpu.dot_dimension_numbers<[1], [0], [0], [1], [0, 0, 1, 1], [], []>} : vector<8x128xbf16>, vector<128x512xbf16>, vector<8x512xf32> -> vector<8x512xf32>
    %c0_3 = arith.constant 0 : index
    %c0_4 = arith.constant 0 : index
    %3 = vector.load %arg3[%c0_3, %c0_4] : memref<1x512xf32, #tpu.memory_space<vmem>>, vector<1x512xf32>
    %4 = vector.broadcast %3 : vector<1x512xf32> to vector<8x512xf32>
    %5 = arith.addf %2, %4 : vector<8x512xf32>
    %cst_5 = arith.constant 0.000000e+00 : f32
    %6 = vector.broadcast %cst_5 : f32 to vector<8x512xf32>
    %7 = arith.maximumf %5, %6 : vector<8x512xf32>
    %8 = arith.truncf %7 : vector<8x512xf32> to vector<8x512xbf16>
    %c0_6 = arith.constant 0 : index
    %c0_7 = arith.constant 0 : index
    %9 = vector.load %arg4[%c0_6, %c0_7] : memref<512x256xbf16, #tpu.memory_space<vmem>>, vector<512x256xbf16>
    %cst_8 = arith.constant dense<0.000000e+00> : vector<8x256xf32>
    %10 = tpu.matmul %8, %9, %cst_8 {dimension_numbers = #tpu.dot_dimension_numbers<[1], [0], [0], [1], [0, 0, 1, 1], [], []>} : vector<8x512xbf16>, vector<512x256xbf16>, vector<8x256xf32> -> vector<8x256xf32>
    %c0_9 = arith.constant 0 : index
    %c0_10 = arith.constant 0 : index
    %11 = vector.load %arg5[%c0_9, %c0_10] : memref<1x256xf32, #tpu.memory_space<vmem>>, vector<1x256xf32>
    %12 = vector.broadcast %11 : vector<1x256xf32> to vector<8x256xf32>
    %13 = arith.addf %10, %12 : vector<8x256xf32>
    %cst_11 = arith.constant 0.000000e+00 : f32
    %14 = vector.broadcast %cst_11 : f32 to vector<8x256xf32>
    %15 = arith.maximumf %13, %14 : vector<8x256xf32>
    %16 = arith.truncf %15 : vector<8x256xf32> to vector<8x256xbf16>
    %c0_12 = arith.constant 0 : index
    %c0_13 = arith.constant 0 : index
    %17 = vector.load %arg6[%c0_12, %c0_13] : memref<256x128xbf16, #tpu.memory_space<vmem>>, vector<256x128xbf16>
    %cst_14 = arith.constant dense<0.000000e+00> : vector<8x128xf32>
    %18 = tpu.matmul %16, %17, %cst_14 {dimension_numbers = #tpu.dot_dimension_numbers<[1], [0], [0], [1], [0, 0, 1, 1], [], []>} : vector<8x256xbf16>, vector<256x128xbf16>, vector<8x128xf32> -> vector<8x128xf32>
    %c0_15 = arith.constant 0 : index
    %c0_16 = arith.constant 0 : index
    %19 = vector.load %arg7[%c0_15, %c0_16] : memref<1x128xf32, #tpu.memory_space<vmem>>, vector<1x128xf32>
    %20 = vector.broadcast %19 : vector<1x128xf32> to vector<8x128xf32>
    %21 = arith.addf %18, %20 : vector<8x128xf32>
    %cst_17 = arith.constant 0.000000e+00 : f32
    %22 = vector.broadcast %cst_17 : f32 to vector<8x128xf32>
    %23 = arith.maximumf %21, %22 : vector<8x128xf32>
    %24 = arith.truncf %23 : vector<8x128xf32> to vector<8x128xbf16>
    %c0_18 = arith.constant 0 : index
    %c0_19 = arith.constant 0 : index
    %25 = vector.load %arg8[%c0_18, %c0_19] : memref<128x32xbf16, #tpu.memory_space<vmem>>, vector<128x32xbf16>
    %cst_20 = arith.constant dense<0.000000e+00> : vector<8x32xf32>
    %26 = tpu.matmul %24, %25, %cst_20 {dimension_numbers = #tpu.dot_dimension_numbers<[1], [0], [0], [1], [0, 0, 1, 1], [], []>} : vector<8x128xbf16>, vector<128x32xbf16>, vector<8x32xf32> -> vector<8x32xf32>
    %c0_21 = arith.constant 0 : index
    %c0_22 = arith.constant 0 : index
    %27 = vector.load %arg9[%c0_21, %c0_22] : memref<1x32xf32, #tpu.memory_space<vmem>>, vector<1x32xf32>
    %28 = vector.broadcast %27 : vector<1x32xf32> to vector<8x32xf32>
    %29 = arith.addf %26, %28 : vector<8x32xf32>
    %cst_23 = arith.constant 0.000000e+00 : f32
    %30 = vector.broadcast %cst_23 : f32 to vector<8x32xf32>
    %31 = arith.maximumf %29, %30 : vector<8x32xf32>
    %32 = arith.truncf %31 : vector<8x32xf32> to vector<8x32xbf16>
    %c0_24 = arith.constant 0 : index
    %c0_25 = arith.constant 0 : index
    %33 = vector.load %arg10[%c0_24, %c0_25] : memref<32x256xbf16, #tpu.memory_space<vmem>>, vector<32x256xbf16>
    %cst_26 = arith.constant dense<0.000000e+00> : vector<8x256xf32>
    %34 = tpu.matmul %32, %33, %cst_26 {dimension_numbers = #tpu.dot_dimension_numbers<[1], [0], [0], [1], [0, 0, 1, 1], [], []>} : vector<8x32xbf16>, vector<32x256xbf16>, vector<8x256xf32> -> vector<8x256xf32>
    %c0_27 = arith.constant 0 : index
    %c0_28 = arith.constant 0 : index
    %35 = vector.load %arg11[%c0_27, %c0_28] : memref<1x256xf32, #tpu.memory_space<vmem>>, vector<1x256xf32>
    %36 = vector.broadcast %35 : vector<1x256xf32> to vector<8x256xf32>
    %37 = arith.addf %34, %36 : vector<8x256xf32>
    %cst_29 = arith.constant 0.000000e+00 : f32
    %38 = vector.broadcast %cst_29 : f32 to vector<8x256xf32>
    %39 = arith.maximumf %37, %38 : vector<8x256xf32>
    %40 = arith.truncf %39 : vector<8x256xf32> to vector<8x256xbf16>
    %c0_30 = arith.constant 0 : index
    %c0_31 = arith.constant 0 : index
    %41 = vector.load %arg12[%c0_30, %c0_31] : memref<256x512xbf16, #tpu.memory_space<vmem>>, vector<256x512xbf16>
    %cst_32 = arith.constant dense<0.000000e+00> : vector<8x512xf32>
    %42 = tpu.matmul %40, %41, %cst_32 {dimension_numbers = #tpu.dot_dimension_numbers<[1], [0], [0], [1], [0, 0, 1, 1], [], []>} : vector<8x256xbf16>, vector<256x512xbf16>, vector<8x512xf32> -> vector<8x512xf32>
    %c0_33 = arith.constant 0 : index
    %c0_34 = arith.constant 0 : index
    %43 = vector.load %arg13[%c0_33, %c0_34] : memref<1x512xf32, #tpu.memory_space<vmem>>, vector<1x512xf32>
    %44 = vector.broadcast %43 : vector<1x512xf32> to vector<8x512xf32>
    %45 = arith.addf %42, %44 : vector<8x512xf32>
    %cst_35 = arith.constant 0.000000e+00 : f32
    %46 = vector.broadcast %cst_35 : f32 to vector<8x512xf32>
    %47 = arith.maximumf %45, %46 : vector<8x512xf32>
    %48 = arith.truncf %47 : vector<8x512xf32> to vector<8x512xbf16>
    %c0_36 = arith.constant 0 : index
    %c0_37 = arith.constant 0 : index
    %49 = vector.load %arg14[%c0_36, %c0_37] : memref<512x128xbf16, #tpu.memory_space<vmem>>, vector<512x128xbf16>
    %cst_38 = arith.constant dense<0.000000e+00> : vector<8x128xf32>
    %50 = tpu.matmul %48, %49, %cst_38 {dimension_numbers = #tpu.dot_dimension_numbers<[1], [0], [0], [1], [0, 0, 1, 1], [], []>} : vector<8x512xbf16>, vector<512x128xbf16>, vector<8x128xf32> -> vector<8x128xf32>
    %c0_39 = arith.constant 0 : index
    %c0_40 = arith.constant 0 : index
    %51 = vector.load %arg15[%c0_39, %c0_40] : memref<1x128xf32, #tpu.memory_space<vmem>>, vector<1x128xf32>
    %52 = vector.broadcast %51 : vector<1x128xf32> to vector<8x128xf32>
    %53 = arith.addf %50, %52 : vector<8x128xf32>
    %c0_41 = arith.constant 0 : index
    %c0_42 = arith.constant 0 : index
    %54 = vector.load %arg16[%c0_41, %c0_42] : memref<8x128xf32, #tpu.memory_space<vmem>>, vector<8x128xf32>
    tpu.vector_store %arg16[%c0_41, %c0_42], %53 {strides = array<i32>} : memref<8x128xf32, #tpu.memory_space<vmem>>, vector<8x128xf32>,
    return
  }
  func.func @transform_0(%arg0: i32) -> (i32, i32) {
    %c0_i32 = arith.constant 0 : i32
    %c0_i32_0 = arith.constant 0 : i32
    return %arg0, %c0_i32 : i32, i32
  }
  func.func @transform_1(%arg0: i32) -> (i32, i32) {
    %c0_i32 = arith.constant 0 : i32
    %c0_i32_0 = arith.constant 0 : i32
    %c0_i32_1 = arith.constant 0 : i32
    return %c0_i32, %c0_i32_0 : i32, i32
  }
  func.func @transform_2(%arg0: i32) -> (i32, i32) {
    %c0_i32 = arith.constant 0 : i32
    %c0_i32_0 = arith.constant 0 : i32
    %c0_i32_1 = arith.constant 0 : i32
    return %c0_i32, %c0_i32_0 : i32, i32
  }
  func.func @transform_3(%arg0: i32) -> (i32, i32) {
    %c0_i32 = arith.constant 0 : i32
    %c0_i32_0 = arith.constant 0 : i32
    %c0_i32_1 = arith.constant 0 : i32
    return %c0_i32, %c0_i32_0 : i32, i32
  }
  func.func @transform_4(%arg0: i32) -> (i32, i32) {
    %c0_i32 = arith.constant 0 : i32
    %c0_i32_0 = arith.constant 0 : i32
    %c0_i32_1 = arith.constant 0 : i32
    return %c0_i32, %c0_i32_0 : i32, i32
  }
  func.func @transform_5(%arg0: i32) -> (i32, i32) {
    %c0_i32 = arith.constant 0 : i32
    %c0_i32_0 = arith.constant 0 : i32
    %c0_i32_1 = arith.constant 0 : i32
    return %c0_i32, %c0_i32_0 : i32, i32
  }
  func.func @transform_6(%arg0: i32) -> (i32, i32) {
    %c0_i32 = arith.constant 0 : i32
    %c0_i32_0 = arith.constant 0 : i32
    %c0_i32_1 = arith.constant 0 : i32
    return %c0_i32, %c0_i32_0 : i32, i32
  }
  func.func @transform_7(%arg0: i32) -> (i32, i32) {
    %c0_i32 = arith.constant 0 : i32
    %c0_i32_0 = arith.constant 0 : i32
    %c0_i32_1 = arith.constant 0 : i32
    return %c0_i32, %c0_i32_0 : i32, i32
  }
  func.func @transform_8(%arg0: i32) -> (i32, i32) {
    %c0_i32 = arith.constant 0 : i32
    %c0_i32_0 = arith.constant 0 : i32
    %c0_i32_1 = arith.constant 0 : i32
    return %c0_i32, %c0_i32_0 : i32, i32
  }
  func.func @transform_9(%arg0: i32) -> (i32, i32) {
    %c0_i32 = arith.constant 0 : i32
    %c0_i32_0 = arith.constant 0 : i32
    %c0_i32_1 = arith.constant 0 : i32
    return %c0_i32, %c0_i32_0 : i32, i32
  }
  func.func @transform_10(%arg0: i32) -> (i32, i32) {
    %c0_i32 = arith.constant 0 : i32
    %c0_i32_0 = arith.constant 0 : i32
    %c0_i32_1 = arith.constant 0 : i32
    return %c0_i32, %c0_i32_0 : i32, i32
  }
  func.func @transform_11(%arg0: i32) -> (i32, i32) {
    %c0_i32 = arith.constant 0 : i32
    %c0_i32_0 = arith.constant 0 : i32
    %c0_i32_1 = arith.constant 0 : i32
    return %c0_i32, %c0_i32_0 : i32, i32
  }
  func.func @transform_12(%arg0: i32) -> (i32, i32) {
    %c0_i32 = arith.constant 0 : i32
    %c0_i32_0 = arith.constant 0 : i32
    %c0_i32_1 = arith.constant 0 : i32
    return %c0_i32, %c0_i32_0 : i32, i32
  }
  func.func @transform_13(%arg0: i32) -> (i32, i32) {
    %c0_i32 = arith.constant 0 : i32
    %c0_i32_0 = arith.constant 0 : i32
    %c0_i32_1 = arith.constant 0 : i32
    return %c0_i32, %c0_i32_0 : i32, i32
  }
  func.func @transform_14(%arg0: i32) -> (i32, i32) {
    %c0_i32 = arith.constant 0 : i32
    %c0_i32_0 = arith.constant 0 : i32
    %c0_i32_1 = arith.constant 0 : i32
    return %c0_i32, %c0_i32_0 : i32, i32
  }
  func.func @transform_15(%arg0: i32) -> (i32, i32) {
    %c0_i32 = arith.constant 0 : i32
    %c0_i32_0 = arith.constant 0 : i32
    return %arg0, %c0_i32 : i32, i32
  }
}

</mosaic_0001>

<bundles_post_ra>
// kernel: tpu_custom_call.1
= control target key start
LH: loop header
LB: loop body
LE: loop exit
PB: predicated region body
PF: predicated region fallthrough
CT: control target
= control target key end

     0   :  { %s3183_s0 = inlined_call_operand.vmem [shape: bf16[8,128], index: 0, kind: input, shape index: {}]   ;;  %s3184_s1 = inlined_call_operand.hbm [shape: bf16[128,512], index: 1, kind: input, shape index: {}]   ;;  %s3185_s2 = inlined_call_operand.vmem [shape: f32[1,512], index: 2, kind: input, shape index: {}]   ;;  %s3186_s3 = inlined_call_operand.hbm [shape: bf16[512,256], index: 3, kind: input, shape index: {}]   ;;  %s3187_s4 = inlined_call_operand.vmem [shape: f32[1,256], index: 4, kind: input, shape index: {}]   ;;  %s3188_s5 = inlined_call_operand.hbm [shape: bf16[256,128], index: 5, kind: input, shape index: {}]   ;;  %s3189_s6 = inlined_call_operand.vmem [shape: f32[1,128], index: 6, kind: input, shape index: {}]   ;;  %s3190_s7 = inlined_call_operand.vmem [shape: bf16[128,32], index: 7, kind: input, shape index: {}]   ;;  %s3191_s8 = inlined_call_operand.vmem [shape: f32[1,32], index: 8, kind: input, shape index: {}]   ;;  %s3192_s9 = inlined_call_operand.vmem [shape: bf16[32,256], index: 9, kind: input, shape index: {}]   ;;  %s3193_s10 = inlined_call_operand.vmem [shape: f32[1,256], index: 10, kind: input, shape index: {}]   ;;  %s3194_s11 = inlined_call_operand.hbm [shape: bf16[256,512], index: 11, kind: input, shape index: {}]   ;;  %s3195_s12 = inlined_call_operand.vmem [shape: f32[1,512], index: 12, kind: input, shape index: {}]   ;;  %s3196_s13 = inlined_call_operand.hbm [shape: bf16[512,128], index: 13, kind: input, shape index: {}]   ;;  %s3197_s14 = inlined_call_operand.vmem [shape: f32[1,128], index: 14, kind: input, shape index: {}]   ;;  %s3198_s15 = inlined_call_operand.hbm [shape: f32[8,128], index: 15, kind: output, shape index: {}]  }
   0x1   :  { %3200 = sst [smem:[#allocation16_spill]] %s3198_s15 }
   0x2   :  { %20 = vsyncpa [#allocation3], 0 }
   0x3   :  { %21 = vsyncpa [#allocation6], 0 }
   0x4   :  { %22 = vsyncpa [#allocation9], 0 }
   0x5   :  { %23 = vsyncpa [#allocation4], 0  ;;  %s2921_s18 = smov [#allocation5]   ;;  %s2781_s22 = scalar_lea.hbm %s3186_s3, 8192 }
   0x6   :  { %s45_s19 = sshll.u32 %s2921_s18, 4  ;;  %p2782_p0 = scmp.ne.s32.totalorder %s3186_s3, %s2781_s22  ;;  %s46_s19 = int_to_ptr.vmem [resolvable:$true] %s45_s19 }
   0x7   :  { %p2785_p1 = scmp.lt.u32.totalorder %s2781_s22, %s3186_s3 }
   0x9   :  { %p2787_p2 = pnand %p2785_p1, %p2782_p0 }
   0xb   :  { %2790 = shalt.err (!%p2787_p2)
}
   0xc   :  { %s2791_s27 = scalar_lea.vmem %s46_s19, 8192  ;;  %p2796_p4 = scmp.lt.s32.totalorder %s46_s19, %s46_s19 }
   0xd   :  { %p2792_p3 = scmp.ne.s32.totalorder %s46_s19, %s2791_s27  ;;  %p2797_p5 = scmp.lt.s32.totalorder %s2791_s27, %s2791_s27 }
   0xf   :  { %p2798_p6 = por %p2797_p5, %p2796_p4 }
  0x11   :  { %p2799_p7 = pnand %p2798_p6, %p2792_p3 }
  0x13   :  { %2802 = shalt.err (!%p2799_p7)
}
  0x14   :  { %s2922_s28 = smov 128   ;;  %s2923_s29 = smov 8  }
  0x15   :  { %51 = dma.hbm_to_vmem [thread:$0]  %s3186_s3, 8192, %s46_s19, [#allocation6], %s2922_s28, %s2922_s28, %s2923_s29  }
  0x16   :  { %s2924_s17 = smov [#allocation8]   ;;  %s2925_s20 = smov [#allocation2]  }
  0x17   :  { %s81_s18 = sshll.u32 %s2924_s17, 4  ;;  %s31_s21 = sshll.u32 %s2925_s20, 4  ;;  %s82_s18 = int_to_ptr.vmem [resolvable:$true] %s81_s18  ;;  %s32_s21 = int_to_ptr.vmem [resolvable:$true] %s31_s21 }
  0x18   :  { %s2803_s24 = scalar_lea.hbm %s3194_s11, 8192 }
  0x19   :  { %p2804_p8 = scmp.ne.s32.totalorder %s3194_s11, %s2803_s24  ;;  %p2807_p9 = scmp.lt.u32.totalorder %s2803_s24, %s3194_s11 }
  0x1b   :  { %p2809_p10 = pnand %p2807_p9, %p2804_p8 }
  0x1d   :  { %2812 = shalt.err (!%p2809_p10)
}
  0x1e   :  { %s2813_s3 = scalar_lea.vmem %s82_s18, 8192  ;;  %p2818_p12 = scmp.lt.s32.totalorder %s82_s18, %s82_s18 }
  0x1f   :  { %p2814_p11 = scmp.ne.s32.totalorder %s82_s18, %s2813_s3  ;;  %p2819_p13 = scmp.lt.s32.totalorder %s2813_s3, %s2813_s3 }
  0x21   :  { %p2820_p0 = por %p2819_p13, %p2818_p12 }
  0x23   :  { %p2821_p1 = pnand %p2820_p0, %p2814_p11 }
  0x25   :  { %2824 = shalt.err (!%p2821_p1)
}
  0x26   :  { %s2926_s19 = smov 256   ;;  %s2927_s28 = smov 16  }
  0x27   :  { %87 = dma.hbm_to_vmem [thread:$0]  %s3194_s11, 8192, %s82_s18, [#allocation9], %s2926_s19, %s2926_s19, %s2927_s28  }
  0x28   :  { %s2825_s15 = scalar_lea.hbm %s3184_s1, 4096 }
  0x29   :  { %p2826_p2 = scmp.ne.s32.totalorder %s3184_s1, %s2825_s15  ;;  %p2829_p3 = scmp.lt.u32.totalorder %s2825_s15, %s3184_s1 }
  0x2b   :  { %p2831_p4 = pnand %p2829_p3, %p2826_p2 }
  0x2d   :  { %2834 = shalt.err (!%p2831_p4)
}
  0x2e   :  { %s2835_s25 = scalar_lea.vmem %s32_s21, 4096  ;;  %p2840_p6 = scmp.lt.s32.totalorder %s32_s21, %s32_s21 }
  0x2f   :  { %p2836_p5 = scmp.ne.s32.totalorder %s32_s21, %s2835_s25  ;;  %p2841_p7 = scmp.lt.s32.totalorder %s2835_s25, %s2835_s25 }
  0x31   :  { %p2842_p8 = por %p2841_p7, %p2840_p6 }
  0x33   :  { %p2843_p9 = pnand %p2842_p8, %p2836_p5 }
  0x35   :  { %2846 = shalt.err (!%p2843_p9)
}
  0x36   :  { %37 = dma.hbm_to_vmem [thread:$0]  %s3184_s1, 4096, %s32_s21, [#allocation3], %s2926_s19, %s2926_s19, %s2927_s28  }
  0x37   :  { %s2928_s26 = smov [#allocation7]   ;;  %s2847_s30 = scalar_lea.hbm %s3188_s5, 2048 }
  0x38   :  { %s59_s27 = sshll.u32 %s2928_s26, 4  ;;  %p2848_p10 = scmp.ne.s32.totalorder %s3188_s5, %s2847_s30  ;;  %s60_s27 = int_to_ptr.vmem [resolvable:$true] %s59_s27 }
  0x39   :  { %p2851_p11 = scmp.lt.u32.totalorder %s2847_s30, %s3188_s5 }
  0x3b   :  { %p2853_p12 = pnand %p2851_p11, %p2848_p10 }
  0x3d   :  { %2856 = shalt.err (!%p2853_p12)
}
  0x3e   :  { %s2857_s22 = scalar_lea.vmem %s60_s27, 2048  ;;  %p2862_p0 = scmp.lt.s32.totalorder %s60_s27, %s60_s27 }
  0x3f   :  { %p2858_p13 = scmp.ne.s32.totalorder %s60_s27, %s2857_s22  ;;  %p2863_p1 = scmp.lt.s32.totalorder %s2857_s22, %s2857_s22 }
  0x41   :  { %p2864_p2 = por %p2863_p1, %p2862_p0 }
  0x43   :  { %p2865_p3 = pnand %p2864_p2, %p2858_p13 }
  0x45   :  { %2868 = shalt.err (!%p2865_p3)
}
  0x46   :  { %s2929_s1 = smov 64   ;;  %s2930_s21 = smov 4  }
  0x47   :  { %65 = dma.hbm_to_vmem [thread:$0]  %s3188_s5, 2048, %s60_s27, [#allocation6], %s2929_s1, %s2929_s1, %s2930_s21  }
  0x48   :  { %s2931_s23 = smov [#allocation10]   ;;  %s2869_s18 = scalar_lea.hbm %s3196_s13, 4096 }
  0x49   :  { %s95_s24 = sshll.u32 %s2931_s23, 4  ;;  %p2870_p4 = scmp.ne.s32.totalorder %s3196_s13, %s2869_s18  ;;  %s96_s24 = int_to_ptr.vmem [resolvable:$true] %s95_s24 }
  0x4a   :  { %p2873_p5 = scmp.lt.u32.totalorder %s2869_s18, %s3196_s13 }
  0x4c   :  { %p2875_p6 = pnand %p2873_p5, %p2870_p4 }
  0x4e   :  { %2878 = shalt.err (!%p2875_p6)
}
  0x4f   :  { %s2879_s16 = scalar_lea.vmem %s96_s24, 4096  ;;  %p2884_p8 = scmp.lt.s32.totalorder %s96_s24, %s96_s24 }
  0x50   :  { %p2880_p7 = scmp.ne.s32.totalorder %s96_s24, %s2879_s16  ;;  %p2885_p9 = scmp.lt.s32.totalorder %s2879_s16, %s2879_s16 }
  0x52   :  { %p2886_p10 = por %p2885_p9, %p2884_p8 }
  0x54   :  { %p2887_p11 = pnand %p2886_p10, %p2880_p7 }
  0x56   :  { %2890 = shalt.err (!%p2887_p11)
}
  0x57   :  { %101 = dma.hbm_to_vmem [thread:$0]  %s3196_s13, 4096, %s96_s24, [#allocation9], %s2929_s1, %s2929_s1, %s2930_s21  }
  0x58   :  { %2913 = dma.done.wait [#allocation3], 4096  }
  0x59   :  { %2914 = vsyncadd [#allocation3], 4294963200 }
  0x5a   :  { %2915 = dma.done.wait [#allocation6], 10240  }
  0x5b   :  { %2916 = vsyncadd [#allocation6], 4294957056 }
  0x5c   :  { %2917 = dma.done.wait [#allocation9], 12288  }
  0x5d   :  { %2918 = vsyncadd [#allocation9], 4294955008  ;;  %v2932_v0 = vmov 0   ;;  %v2479_v1 = vld [vmem:[#allocation2 + $0x4] ss:$16 sps:$4 sm:$0xff]   ;;  %vm2934_vm0 = vmmov 0  }
  0x5e   :  { %367 = vmatprep.mubr.bf16.mxu0 %v2932_v0  ;;  %408 = vmatprep.mubr.bf16.mxu1 %v2932_v0  ;;  %v2481_v2 = vld [vmem:[#allocation2] ss:$16 sps:$4 sm:$0xff]   ;;  %v2482_v3 = vld [vmem:[#allocation2 + $0x24] ss:$16 sps:$4 sm:$0xff]   ;;  %v2503_v10 = vld [vmem:[#allocation2 + $0xc] ss:$16 sps:$4 sm:$0xff]  }
  0x5f   :  { %335 = vmatprep.subr.bf16.mxu0 %v2479_v1  ;;  %v2484_v4 = vld [vmem:[#allocation2 + $0x20] ss:$16 sps:$4 sm:$0xff]   ;;  %v2485_v5 = vld [vmem:[#allocation2 + $0x44] ss:$16 sps:$4 sm:$0xff]   ;;  %v2505_v11 = vld [vmem:[#allocation2 + $0x8] ss:$16 sps:$4 sm:$0xff]   ;;  %376 = vmatprep.subr.bf16.mxu1 %v2503_v10 }
  0x60   :  { %336 = vmatpush1.bf16.msra.mxu0 %v2481_v2  ;;  %v2487_v6 = vld [vmem:[#allocation2 + $0x40] ss:$16 sps:$4 sm:$0xff]   ;;  %v2488_v7 = vld [vmem:[#allocation2 + $0x64] ss:$16 sps:$4 sm:$0xff]   ;;  %v2506_v12 = vld [vmem:[#allocation2 + $0x2c] ss:$16 sps:$4 sm:$0xff]   ;;  %377 = vmatpush1.bf16.msra.mxu1 %v2505_v11 }
  0x61   :  { %337 = vmatprep.subr.bf16.mxu0 %v2482_v3  ;;  %v2490_v8 = vld [vmem:[#allocation2 + $0x60] ss:$16 sps:$4 sm:$0xff]   ;;  %v2491_v9 = vld [vmem:[#allocation2 + $0x84] ss:$16 sps:$4 sm:$0xff]   ;;  %v2508_v14 = vld [vmem:[#allocation2 + $0x28] ss:$16 sps:$4 sm:$0xff]   ;;  %378 = vmatprep.subr.bf16.mxu1 %v2506_v12 }
  0x62   :  { %v2493_v13 = vld [vmem:[#allocation2 + $0x80] ss:$16 sps:$4 sm:$0xff]   ;;  %v2509_v15 = vld [vmem:[#allocation2 + $0x4c] ss:$16 sps:$4 sm:$0xff]   ;;  %v2494_v16 = vld [vmem:[#allocation2 + $0xa4] ss:$16 sps:$4 sm:$0xff]  }
  0x63   :  { %v2496_v17 = vld [vmem:[#allocation2 + $0xa0] ss:$16 sps:$4 sm:$0xff]   ;;  %v2511_v18 = vld [vmem:[#allocation2 + $0x48] ss:$16 sps:$4 sm:$0xff]   ;;  %v2512_v19 = vld [vmem:[#allocation2 + $0x6c] ss:$16 sps:$4 sm:$0xff]  }
  0x64   :  { %338 = vmatpush1.bf16.msra.mxu0 %v2484_v4  ;;  %379 = vmatpush1.bf16.msra.mxu1 %v2508_v14  ;;  %v2497_v20 = vld [vmem:[#allocation2 + $0xc4] ss:$16 sps:$4 sm:$0xff]   ;;  %v2499_v21 = vld [vmem:[#allocation2 + $0xc0] ss:$16 sps:$4 sm:$0xff]   ;;  %v2514_v22 = vld [vmem:[#allocation2 + $0x68] ss:$16 sps:$4 sm:$0xff]  }
  0x65   :  { %339 = vmatprep.subr.bf16.mxu0 %v2485_v5  ;;  %380 = vmatprep.subr.bf16.mxu1 %v2509_v15  ;;  %v2515_v23 = vld [vmem:[#allocation2 + $0x8c] ss:$16 sps:$4 sm:$0xff]   ;;  %v2500_v24 = vld [vmem:[#allocation2 + $0xe4] ss:$16 sps:$4 sm:$0xff]   ;;  %v2502_v25 = vld [vmem:[#allocation2 + $0xe0] ss:$16 sps:$4 sm:$0xff]  }
  0x66   :  { %v2517_v26 = vld [vmem:[#allocation2 + $0x88] ss:$16 sps:$4 sm:$0xff]   ;;  %v2518_v27 = vld [vmem:[#allocation2 + $0xac] ss:$16 sps:$4 sm:$0xff]   ;;  %v120_v29 = vld [vmem:[%s3183_s0] sm:$0xf] }
  0x67   :  { %v2529_v28 = vld [vmem:[#allocation5 + $0x4] ss:$8 sps:$4 sm:$0xff]   ;;  %v2520_v30 = vld [vmem:[#allocation2 + $0xa8] ss:$16 sps:$4 sm:$0xff]   ;;  %v2532_v33 = vld [vmem:[#allocation5 + $0x14] ss:$8 sps:$4 sm:$0xff]  }
  0x68   :  { %340 = vmatpush1.bf16.msra.mxu0 %v2487_v6  ;;  %381 = vmatpush1.bf16.msra.mxu1 %v2511_v18  ;;  %v2521_v31 = vld [vmem:[#allocation2 + $0xcc] ss:$16 sps:$4 sm:$0xff]   ;;  %v2527_v32 = vld [vmem:[#allocation5] ss:$8 sps:$4 sm:$0xff]   ;;  %v2530_v36 = vld [vmem:[#allocation5 + $0x10] ss:$8 sps:$4 sm:$0xff]  }
  0x69   :  { %341 = vmatprep.subr.bf16.mxu0 %v2488_v7  ;;  %382 = vmatprep.subr.bf16.mxu1 %v2512_v19  ;;  %v2523_v34 = vld [vmem:[#allocation2 + $0xc8] ss:$16 sps:$4 sm:$0xff]   ;;  %v2524_v35 = vld [vmem:[#allocation2 + $0xec] ss:$16 sps:$4 sm:$0xff]   ;;  %v2623_v4 = vld [vmem:[#allocation7 + $0x40] sm:$0xff]   ;;  %vm1233_vm1 = vcmask 261120  }
  0x6a   :  { %v2535_v37 = vld [vmem:[#allocation5 + $0x24] ss:$8 sps:$4 sm:$0xff]   ;;  %v2526_v38 = vld [vmem:[#allocation2 + $0xe8] ss:$16 sps:$4 sm:$0xff]   ;;  %v2538_v40 = vld [vmem:[#allocation5 + $0x34] ss:$8 sps:$4 sm:$0xff]  }
  0x6b   :  { %v2533_v39 = vld [vmem:[#allocation5 + $0x20] ss:$8 sps:$4 sm:$0xff]   ;;  %v2536_v41 = vld [vmem:[#allocation5 + $0x30] ss:$8 sps:$4 sm:$0xff]   ;;  %v2541_v42 = vld [vmem:[#allocation5 + $0x44] ss:$8 sps:$4 sm:$0xff]  }
  0x6c   :  { %342 = vmatpush1.bf16.msra.mxu0 %v2490_v8  ;;  %383 = vmatpush1.bf16.msra.mxu1 %v2514_v22  ;;  %v2539_v43 = vld [vmem:[#allocation5 + $0x40] ss:$8 sps:$4 sm:$0xff]   ;;  %v2544_v44 = vld [vmem:[#allocation5 + $0x54] ss:$8 sps:$4 sm:$0xff]   ;;  %v2542_v45 = vld [vmem:[#allocation5 + $0x50] ss:$8 sps:$4 sm:$0xff]  }
  0x6d   :  { %343 = vmatprep.subr.bf16.mxu0 %v2491_v9  ;;  %384 = vmatprep.subr.bf16.mxu1 %v2515_v23  ;;  %v2547_v46 = vld [vmem:[#allocation5 + $0x64] ss:$8 sps:$4 sm:$0xff]   ;;  %v2545_v47 = vld [vmem:[#allocation5 + $0x60] ss:$8 sps:$4 sm:$0xff]   ;;  %v2550_v48 = vld [vmem:[#allocation5 + $0x74] ss:$8 sps:$4 sm:$0xff]  }
  0x6e   :  { %v2548_v49 = vld [vmem:[#allocation5 + $0x70] ss:$8 sps:$4 sm:$0xff]   ;;  %v2553_v50 = vld [vmem:[#allocation5 + $0x84] ss:$8 sps:$4 sm:$0xff]   ;;  %v2551_v51 = vld [vmem:[#allocation5 + $0x80] ss:$8 sps:$4 sm:$0xff]  }
  0x6f   :  { %v2556_v52 = vld [vmem:[#allocation5 + $0x94] ss:$8 sps:$4 sm:$0xff]   ;;  %v2554_v53 = vld [vmem:[#allocation5 + $0x90] ss:$8 sps:$4 sm:$0xff]   ;;  %v2559_v54 = vld [vmem:[#allocation5 + $0xa4] ss:$8 sps:$4 sm:$0xff]  }
  0x70   :  { %344 = vmatpush1.bf16.msra.mxu0 %v2493_v13  ;;  %385 = vmatpush1.bf16.msra.mxu1 %v2517_v26  ;;  %v2557_v55 = vld [vmem:[#allocation5 + $0xa0] ss:$8 sps:$4 sm:$0xff]   ;;  %v2562_v56 = vld [vmem:[#allocation5 + $0xb4] ss:$8 sps:$4 sm:$0xff]   ;;  %v2560_v57 = vld [vmem:[#allocation5 + $0xb0] ss:$8 sps:$4 sm:$0xff]  }
  0x71   :  { %345 = vmatprep.subr.bf16.mxu0 %v2494_v16  ;;  %386 = vmatprep.subr.bf16.mxu1 %v2518_v27  ;;  %v2565_v58 = vld [vmem:[#allocation5 + $0xc4] ss:$8 sps:$4 sm:$0xff]   ;;  %v2563_v59 = vld [vmem:[#allocation5 + $0xc0] ss:$8 sps:$4 sm:$0xff]   ;;  %v2568_v60 = vld [vmem:[#allocation5 + $0xd4] ss:$8 sps:$4 sm:$0xff]   ;;  %v155_v16 = vlaneseq }
  0x72   :  { %v2566_v61 = vld [vmem:[#allocation5 + $0xd0] ss:$8 sps:$4 sm:$0xff]   ;;  %v2571_v62 = vld [vmem:[#allocation5 + $0xe4] ss:$8 sps:$4 sm:$0xff]   ;;  %v2569_v63 = vld [vmem:[#allocation5 + $0xe0] ss:$8 sps:$4 sm:$0xff]  }
  0x73   :  { %v2574_v1 = vld [vmem:[#allocation5 + $0xf4] ss:$8 sps:$4 sm:$0xff]   ;;  %v2572_v2 = vld [vmem:[#allocation5 + $0xf0] ss:$8 sps:$4 sm:$0xff]   ;;  %v2577_v3 = vld [vmem:[#allocation5 + $0x104] ss:$8 sps:$4 sm:$0xff]  }
  0x74   :  { %346 = vmatpush1.bf16.msra.mxu0 %v2496_v17  ;;  %387 = vmatpush1.bf16.msra.mxu1 %v2520_v30  ;;  %v2624_v5 = vld [vmem:[#allocation7] sm:$0xff]   ;;  %v2625_v6 = vld [vmem:[#allocation7 + $0x48] sm:$0xff]   ;;  %v2627_v8 = vld [vmem:[#allocation7 + $0x50] sm:$0xff]   ;;  %v3081_v17 = vshrl.u32 %v155_v16, 7  ;;  %s2935_s19 = smov [#allocation11]  }
  0x75   :  { %347 = vmatprep.subr.bf16.mxu0 %v2497_v20  ;;  %388 = vmatprep.subr.bf16.mxu1 %v2521_v31  ;;  %v2626_v7 = vld [vmem:[#allocation7 + $0x8] sm:$0xff]   ;;  %v2628_v9 = vld [vmem:[#allocation7 + $0x10] sm:$0xff]   ;;  %v2629_v10 = vld [vmem:[#allocation7 + $0x58] sm:$0xff]   ;;  %s2128_s28 = sshll.u32 %s2935_s19, 4  ;;  %s2129_s28 = int_to_ptr.vmem [resolvable:$true] %s2128_s28 }
  0x76   :  { %v2630_v11 = vld [vmem:[#allocation7 + $0x18] sm:$0xff]   ;;  %v2631_v12 = vld [vmem:[#allocation7 + $0x60] sm:$0xff]   ;;  %v2633_v14 = vld [vmem:[#allocation7 + $0x68] sm:$0xff]   ;;  %v3084_v18 = vsub.s32 0, %v3081_v17  ;;  %v3092_v20 = vsub.s32 1, %v3081_v17  ;;  %v169_v31 = vsub.s32 3, %v3081_v17  ;;  %p2896_p13 = scmp.lt.s32.totalorder %s2129_s28, %s2129_s28 }
  0x77   :  { %v2632_v13 = vld [vmem:[#allocation7 + $0x20] sm:$0xff]   ;;  %v2634_v15 = vld [vmem:[#allocation7 + $0x28] sm:$0xff]   ;;  %v2636_v16 = vld [vmem:[#allocation7 + $0x30] sm:$0xff]   ;;  %s2891_s23 = scalar_lea.vmem %s2129_s28, 128 }
  0x78   :  { %348 = vmatpush1.bf16.msra.mxu0 %v2499_v21  ;;  %389 = vmatpush1.bf16.msra.mxu1 %v2523_v34  ;;  %v3089_v19 = vld [vmem:[%s3185_s2] sm:$0xf]  ;;  %p2892_p12 = scmp.ne.s32.totalorder %s2129_s28, %s2891_s23  ;;  %p2897_p0 = scmp.lt.s32.totalorder %s2891_s23, %s2891_s23 }
  0x79   :  { %349 = vmatprep.subr.bf16.mxu0 %v2500_v24  ;;  %390 = vmatprep.subr.bf16.mxu1 %v2524_v35  ;;  %v158_v21 = vrot.slane %v3089_v19, %v3084_v18  ;;  %v162_v22 = vrot.slane %v3089_v19, %v3092_v20  ;;  %v2580_v35 = vld [vmem:[#allocation5 + $0x114] ss:$8 sps:$4 sm:$0xff]  }
  0x7a   :  { %p2898_p1 = por %p2897_p0, %p2896_p13 }
  0x7c   :  { %350 = vmatpush1.bf16.msra.mxu0 %v2502_v25  ;;  %391 = vmatpush1.bf16.msra.mxu1 %v2526_v38  ;;  %v2583_v38 = vld [vmem:[#allocation5 + $0x124] ss:$8 sps:$4 sm:$0xff]   ;;  %p2899_p2 = pnand %p2898_p1, %p2892_p12 }
  0x7d   :  { %821 = vmatprep.subr.bf16.mxu0 %v2529_v28  ;;  %2363 = vmatprep.subr.bf16.mxu1 %v2623_v4  ;;  %v165_v4 = vsub.s32 2, %v3081_v17 }
  0x7f   :  { %368 = vmatmul.mubr.bf16.vlgmr.msra.gmra.mrb[0].mxu0 %v120_v29  ;;  %409 = vmatmul.mubr.bf16.vlgmr.msra.gmra.mrb[0].mxu1 %v120_v29 }
  0x80   :  { %822 = vmatpush1.bf16.msra.mxu0 %v2527_v32  ;;  %2364 = vmatpush3.bf16.msra.mxu1 %v2624_v5  ;;  %v2616_v5 = vld [vmem:[#allocation5 + $0x1d4] ss:$8 sps:$4 sm:$0xff]  }
  0x81   :  { %823 = vmatprep.subr.bf16.mxu0 %v2532_v33  ;;  %2365 = vmatprep.subr.bf16.mxu1 %v2625_v6  ;;  %v2575_v33 = vld [vmem:[#allocation5 + $0x100] ss:$8 sps:$4 sm:$0xff]   ;;  %v2614_v6 = vld [vmem:[#allocation5 + $0x1d0] ss:$8 sps:$4 sm:$0xff]  }
  0x84   :  { %824 = vmatpush1.bf16.msra.mxu0 %v2530_v36  ;;  %2366 = vmatpush3.bf16.msra.mxu1 %v2626_v7  ;;  %v170_v36 = vrot.slane %v3089_v19, %v169_v31  ;;  %v166_v7 = vrot.slane %v3089_v19, %v165_v4  ;;  %v2638_v19 = vld [vmem:[#allocation7 + $0x38] sm:$0xff]  }
  0x85   :  { %825 = vmatprep.subr.bf16.mxu0 %v2535_v37  ;;  %2367 = vmatprep.subr.bf16.mxu1 %v2627_v8  ;;  %v2578_v37 = vld [vmem:[#allocation5 + $0x110] ss:$8 sps:$4 sm:$0xff]   ;;  %v2619_v8 = vld [vmem:[#allocation5 + $0x1e4] ss:$8 sps:$4 sm:$0xff]  }
  0x88   :  { %826 = vmatpush1.bf16.msra.mxu0 %v2533_v39  ;;  %2368 = vmatpush3.bf16.msra.mxu1 %v2628_v9  ;;  %v2617_v9 = vld [vmem:[#allocation5 + $0x1e0] ss:$8 sps:$4 sm:$0xff]  }
  0x89   :  { %827 = vmatprep.subr.bf16.mxu0 %v2538_v40  ;;  %2369 = vmatprep.subr.bf16.mxu1 %v2629_v10 }
  0x8c   :  { %828 = vmatpush1.bf16.msra.mxu0 %v2536_v41  ;;  %2370 = vmatpush3.bf16.msra.mxu1 %v2630_v11  ;;  %v2622_v11 = vld [vmem:[#allocation5 + $0x1f4] ss:$8 sps:$4 sm:$0xff]  }
  0x8d   :  { %829 = vmatprep.subr.bf16.mxu0 %v2541_v42  ;;  %2371 = vmatprep.subr.bf16.mxu1 %v2631_v12  ;;  %v2620_v12 = vld [vmem:[#allocation5 + $0x1f0] ss:$8 sps:$4 sm:$0xff]  }
  0x90   :  { %830 = vmatpush1.bf16.msra.mxu0 %v2539_v43  ;;  %2372 = vmatpush3.bf16.msra.mxu1 %v2632_v13  ;;  %v2581_v43 = vld [vmem:[#allocation5 + $0x120] ss:$8 sps:$4 sm:$0xff]  }
  0x91   :  { %831 = vmatprep.subr.bf16.mxu0 %v2544_v44  ;;  %2373 = vmatprep.subr.bf16.mxu1 %v2633_v14 }
  0x94   :  { %832 = vmatpush1.bf16.msra.mxu0 %v2542_v45  ;;  %2374 = vmatpush3.bf16.msra.mxu1 %v2634_v15  ;;  %v2586_v45 = vld [vmem:[#allocation5 + $0x134] ss:$8 sps:$4 sm:$0xff]  }
  0x95   :  { %833 = vmatprep.subr.bf16.mxu0 %v2547_v46  ;;  %v2635_v15 = vld [vmem:[#allocation7 + $0x70] sm:$0xff]  }
  0x96   :  { %2375 = vmatprep.subr.bf16.mxu1 %v2635_v15  ;;  %v2710_v15 = vld [vmem:[#allocation8 + $0x128] ss:$16 sps:$4 sm:$0xff]  }
  0x98   :  { %834 = vmatpush1.bf16.msra.mxu0 %v2545_v47  ;;  %2376 = vmatpush3.bf16.msra.mxu1 %v2636_v16  ;;  %v2718_v16 = vld [vmem:[#allocation8 + $0x14c] ss:$16 sps:$4 sm:$0xff]  }
  0x99   :  { %835 = vmatprep.subr.bf16.mxu0 %v2550_v48  ;;  %v2584_v48 = vld [vmem:[#allocation5 + $0x130] ss:$8 sps:$4 sm:$0xff]  }
  0x9c   :  { %836 = vmatpush1.bf16.msra.mxu0 %v2548_v49  ;;  %v2589_v49 = vld [vmem:[#allocation5 + $0x144] ss:$8 sps:$4 sm:$0xff]  }
  0x9d   :  { %837 = vmatprep.subr.bf16.mxu0 %v2553_v50  ;;  %v2587_v50 = vld [vmem:[#allocation5 + $0x140] ss:$8 sps:$4 sm:$0xff]  }
  0xa0   :  { %838 = vmatpush1.bf16.msra.mxu0 %v2551_v51  ;;  %v2592_v51 = vld [vmem:[#allocation5 + $0x154] ss:$8 sps:$4 sm:$0xff]  }
  0xa1   :  { %839 = vmatprep.subr.bf16.mxu0 %v2556_v52  ;;  %v2590_v52 = vld [vmem:[#allocation5 + $0x150] ss:$8 sps:$4 sm:$0xff]  }
  0xa4   :  { %840 = vmatpush1.bf16.msra.mxu0 %v2554_v53  ;;  %v2595_v53 = vld [vmem:[#allocation5 + $0x164] ss:$8 sps:$4 sm:$0xff]  }
  0xa5   :  { %841 = vmatprep.subr.bf16.mxu0 %v2559_v54  ;;  %v2593_v54 = vld [vmem:[#allocation5 + $0x160] ss:$8 sps:$4 sm:$0xff]  }
  0xa8   :  { %842 = vmatpush1.bf16.msra.mxu0 %v2557_v55  ;;  %v2598_v55 = vld [vmem:[#allocation5 + $0x174] ss:$8 sps:$4 sm:$0xff]  }
  0xa9   :  { %843 = vmatprep.subr.bf16.mxu0 %v2562_v56  ;;  %v2596_v56 = vld [vmem:[#allocation5 + $0x170] ss:$8 sps:$4 sm:$0xff]  }
  0xac   :  { %844 = vmatpush1.bf16.msra.mxu0 %v2560_v57  ;;  %v2601_v57 = vld [vmem:[#allocation5 + $0x184] ss:$8 sps:$4 sm:$0xff]  }
  0xad   :  { %845 = vmatprep.subr.bf16.mxu0 %v2565_v58  ;;  %v2599_v58 = vld [vmem:[#allocation5 + $0x180] ss:$8 sps:$4 sm:$0xff]  }
  0xb0   :  { %846 = vmatpush1.bf16.msra.mxu0 %v2563_v59  ;;  %v2604_v59 = vld [vmem:[#allocation5 + $0x194] ss:$8 sps:$4 sm:$0xff]  }
  0xb1   :  { %847 = vmatprep.subr.bf16.mxu0 %v2568_v60  ;;  %v2602_v60 = vld [vmem:[#allocation5 + $0x190] ss:$8 sps:$4 sm:$0xff]  }
  0xb4   :  { %848 = vmatpush1.bf16.msra.mxu0 %v2566_v61  ;;  %v2607_v61 = vld [vmem:[#allocation5 + $0x1a4] ss:$8 sps:$4 sm:$0xff]  }
  0xb5   :  { %849 = vmatprep.subr.bf16.mxu0 %v2571_v62  ;;  %v2605_v62 = vld [vmem:[#allocation5 + $0x1a0] ss:$8 sps:$4 sm:$0xff]  }
  0xb8   :  { %850 = vmatpush1.bf16.msra.mxu0 %v2569_v63  ;;  %v2610_v63 = vld [vmem:[#allocation5 + $0x1b4] ss:$8 sps:$4 sm:$0xff]  }
  0xb9   :  { %851 = vmatprep.subr.bf16.mxu0 %v2574_v1  ;;  %v2608_v1 = vld [vmem:[#allocation5 + $0x1b0] ss:$8 sps:$4 sm:$0xff]  }
  0xbc   :  { %852 = vmatpush1.bf16.msra.mxu0 %v2572_v2  ;;  %v2613_v2 = vld [vmem:[#allocation5 + $0x1c4] ss:$8 sps:$4 sm:$0xff]  }
  0xbd   :  { %862 = vmatprep.subr.bf16.mxu0 %v2577_v3  ;;  %v2611_v3 = vld [vmem:[#allocation5 + $0x1c0] ss:$8 sps:$4 sm:$0xff]  }
 0x152   :  { %v369_v23 = vpop.f32.mrb[0].mxu0  ;;  %v410_v39 = vpop.f32.mrb[0].mxu1 }
 0x153   :  { %v370_v24 = vadd.f32 %v369_v23, %v158_v21  ;;  %v371_v25 = vpop.f32.mrb[1].mxu0  ;;  %v412_v40 = vpop.f32.mrb[1].mxu1  ;;  %v411_v10 = vadd.f32 %v410_v39, %v166_v7  ;;  %v2637_v21 = vld [vmem:[#allocation7 + $0x78] sm:$0xff]   ;;  %v489_v23 = vld [vmem:[%s3187_s4] sm:$0x3]  ;;  %v2641_v39 = vld [vmem:[%s3190_s7 + $0x10] sm:$0xff]  }
 0x154   :  { %v372_v26 = vadd.f32 %v371_v25, %v162_v22  ;;  %v373_v27 = vpop.f32.mrb[2].mxu0  ;;  %v413_v41 = vadd.f32 %v412_v40, %v170_v36  ;;  %v414_v42 = vpop.f32.mrb[2].mxu1  ;;  %2377 = vmatprep.subr.bf16.mxu1 %v2637_v21  ;;  %v2933_v22 = vmov 0.0   ;;  %v498_v25 = vrot.slane %v489_v23, %v3092_v20  ;;  %v2639_v36 = vld [vmem:[%s3190_s7] sm:$0xff]   ;;  %v2642_v40 = vld [vmem:[%s3190_s7 + $0x18] sm:$0xff]  }
 0x155   :  { %v417_v28 = vmax.f32 %v370_v24, 0.0  ;;  %v374_v29 = vpop.f32.mrb[3].mxu0  ;;  %v415_v44 = vpop.f32.mrb[3].mxu1  ;;  %v419_v13 = vmax.f32 %v411_v10, 0.0  ;;  %2378 = vmatpush3.bf16.msra.mxu1 %v2638_v19  ;;  %v494_v24 = vrot.slane %v489_v23, %v3084_v18  ;;  %v2644_v42 = vld [vmem:[%s3190_s7 + $0x28] sm:$0xff]  }
 0x156   :  { %v418_v30 = vmax.f32 %v372_v26, 0.0  ;;  %v420_v46 = vmax.f32 %v413_v41, 0.0  ;;  %2438 = vmatprep.subr.bf16.mxu1 %v2933_v22  ;;  %v2643_v41 = vld [vmem:[%s3190_s7 + $0x20] sm:$0xff]   ;;  %v2646_v44 = vld [vmem:[%s3190_s7 + $0x38] sm:$0xff]  }
 0x157   :  { %v421_v34 = vpack.c.bf16 %v417_v28, %v417_v28  ;;  %v423_v14 = vpack.c.bf16 %v419_v13, %v419_v13  ;;  %v2686_v7 = vld [vmem:[#allocation8 + $0xa8] ss:$16 sps:$4 sm:$0xff]   ;;  %v2700_v10 = vld [vmem:[#allocation8 + $0xec] ss:$16 sps:$4 sm:$0xff]  }
 0x158   :  { %v422_v32 = vpack.c.bf16 %v418_v30, %v418_v30  ;;  %v424_v47 = vpack.c.bf16 %v420_v46, %v420_v46  ;;  %v2704_v13 = vld [vmem:[#allocation8 + $0x108] ss:$16 sps:$4 sm:$0xff]   ;;  %v2724_v19 = vld [vmem:[#allocation8 + $0x16c] ss:$16 sps:$4 sm:$0xff]  }
 0x159   :  { %v2716_v21 = vld [vmem:[#allocation8 + $0x148] ss:$16 sps:$4 sm:$0xff]   ;;  %v2730_v23 = vld [vmem:[#allocation8 + $0x18c] ss:$16 sps:$4 sm:$0xff]  }
 0x15a   :  { %853 = vmatprep.mubr.bf16.mxu0 %v422_v32 }
 0x15b   :  { %854 = vmatmul.mubr.bf16.vlgmr.msra.gmra.mrb[4].mxu0 %v421_v34 }
 0x15c   :  { %863 = vmatpush1.bf16.msra.mxu0 %v2575_v33  ;;  %894 = vmatprep.mubr.bf16.mxu0 %v424_v47  ;;  %v2235_v47 = vld [vmem:[%s3189_s6] ss:$0 sm:$0xff] }
 0x15d   :  { %864 = vmatprep.subr.bf16.mxu0 %v2580_v35 }
 0x160   :  { %865 = vmatpush1.bf16.msra.mxu0 %v2578_v37 }
 0x161   :  { %866 = vmatprep.subr.bf16.mxu0 %v2583_v38  ;;  %v2640_v38 = vld [vmem:[%s3190_s7 + $0x8] sm:$0xff]  }
 0x164   :  { %867 = vmatpush1.bf16.msra.mxu0 %v2581_v43  ;;  %v2645_v43 = vld [vmem:[%s3190_s7 + $0x30] sm:$0xff]  }
 0x165   :  { %868 = vmatprep.subr.bf16.mxu0 %v2586_v45  ;;  %v2649_v45 = vld [vmem:[%s3192_s9 + $0x4] ss:$8 sps:$4 sm:$0xff]  }
 0x168   :  { %869 = vmatpush1.bf16.msra.mxu0 %v2584_v48 }
 0x169   :  { %870 = vmatprep.subr.bf16.mxu0 %v2589_v49 }
 0x16c   :  { %871 = vmatpush1.bf16.msra.mxu0 %v2587_v50 }
 0x16d   :  { %872 = vmatprep.subr.bf16.mxu0 %v2592_v51 }
 0x170   :  { %873 = vmatpush1.bf16.msra.mxu0 %v2590_v52 }
 0x171   :  { %874 = vmatprep.subr.bf16.mxu0 %v2595_v53 }
 0x174   :  { %875 = vmatpush1.bf16.msra.mxu0 %v2593_v54  ;;  %v2647_v54 = vld [vmem:[%s3192_s9] ss:$8 sps:$4 sm:$0xff]  }
 0x175   :  { %876 = vmatprep.subr.bf16.mxu0 %v2598_v55 }
 0x178   :  { %877 = vmatpush1.bf16.msra.mxu0 %v2596_v56  ;;  %v2652_v56 = vld [vmem:[%s3192_s9 + $0x14] ss:$8 sps:$4 sm:$0xff]  }
 0x179   :  { %878 = vmatprep.subr.bf16.mxu0 %v2601_v57  ;;  %v2650_v57 = vld [vmem:[%s3192_s9 + $0x10] ss:$8 sps:$4 sm:$0xff]  }
 0x17c   :  { %879 = vmatpush1.bf16.msra.mxu0 %v2599_v58  ;;  %v2655_v58 = vld [vmem:[#allocation8 + $0x4] ss:$16 sps:$4 sm:$0xff]  }
 0x17d   :  { %880 = vmatprep.subr.bf16.mxu0 %v2604_v59  ;;  %v2656_v59 = vld [vmem:[#allocation8 + $0x8] ss:$16 sps:$4 sm:$0xff]  }
 0x180   :  { %881 = vmatpush1.bf16.msra.mxu0 %v2602_v60  ;;  %v2658_v60 = vld [vmem:[#allocation8 + $0xc] ss:$16 sps:$4 sm:$0xff]  }
 0x181   :  { %882 = vmatprep.subr.bf16.mxu0 %v2607_v61  ;;  %v2664_v61 = vld [vmem:[#allocation8 + $0x2c] ss:$16 sps:$4 sm:$0xff]  }
 0x184   :  { %883 = vmatpush1.bf16.msra.mxu0 %v2605_v62  ;;  %v2662_v62 = vld [vmem:[#allocation8 + $0x28] ss:$16 sps:$4 sm:$0xff]  }
 0x185   :  { %884 = vmatprep.subr.bf16.mxu0 %v2610_v63  ;;  %v2668_v63 = vld [vmem:[#allocation8 + $0x48] ss:$16 sps:$4 sm:$0xff]  }
 0x188   :  { %885 = vmatpush1.bf16.msra.mxu0 %v2608_v1  ;;  %v2676_v1 = vld [vmem:[#allocation8 + $0x6c] ss:$16 sps:$4 sm:$0xff]  }
 0x189   :  { %886 = vmatprep.subr.bf16.mxu0 %v2613_v2  ;;  %v2674_v2 = vld [vmem:[#allocation8 + $0x68] ss:$16 sps:$4 sm:$0xff]  }
 0x18c   :  { %887 = vmatpush1.bf16.msra.mxu0 %v2611_v3  ;;  %v2682_v3 = vld [vmem:[#allocation8 + $0x8c] ss:$16 sps:$4 sm:$0xff]  }
 0x18d   :  { %888 = vmatprep.subr.bf16.mxu0 %v2616_v5  ;;  %v2680_v5 = vld [vmem:[#allocation8 + $0x88] ss:$16 sps:$4 sm:$0xff]  }
 0x190   :  { %889 = vmatpush1.bf16.msra.mxu0 %v2614_v6  ;;  %v2688_v6 = vld [vmem:[#allocation8 + $0xac] ss:$16 sps:$4 sm:$0xff]  }
 0x191   :  { %890 = vmatprep.subr.bf16.mxu0 %v2619_v8  ;;  %v2694_v8 = vld [vmem:[#allocation8 + $0xcc] ss:$16 sps:$4 sm:$0xff]  }
 0x194   :  { %891 = vmatpush1.bf16.msra.mxu0 %v2617_v9  ;;  %v2692_v9 = vld [vmem:[#allocation8 + $0xc8] ss:$16 sps:$4 sm:$0xff]  }
 0x195   :  { %892 = vmatprep.subr.bf16.mxu0 %v2622_v11  ;;  %v2698_v11 = vld [vmem:[#allocation8 + $0xe8] ss:$16 sps:$4 sm:$0xff]  }
 0x198   :  { %893 = vmatpush1.bf16.msra.mxu0 %v2620_v12  ;;  %v2706_v12 = vld [vmem:[#allocation8 + $0x10c] ss:$16 sps:$4 sm:$0xff]  }
 0x199   :  { %1729 = vmatprep.subr.bf16.mxu0 %v2658_v60  ;;  %v2725_v60 = vld [vmem:[#allocation8 + $0x180] ss:$16 sps:$4 sm:$0xff]  }
 0x19b   :  { %895 = vmatmul.mubr.bf16.vlgmr.msra.gmra.mrb[4].mxu0 %v423_v14  ;;  %v2712_v14 = vld [vmem:[#allocation8 + $0x12c] ss:$16 sps:$4 sm:$0xff]  }
 0x19c   :  { %1730 = vmatpush1.bf16.msra.mxu0 %v2656_v59  ;;  %v2727_v59 = vld [vmem:[#allocation8 + $0x184] ss:$16 sps:$4 sm:$0xff]  }
 0x19d   :  { %1731 = vmatprep.subr.bf16.mxu0 %v2664_v61  ;;  %v2733_v61 = vld [vmem:[#allocation8 + $0x1a4] ss:$16 sps:$4 sm:$0xff]  }
 0x1a0   :  { %1732 = vmatpush1.bf16.msra.mxu0 %v2662_v62  ;;  %v2731_v62 = vld [vmem:[#allocation8 + $0x1a0] ss:$16 sps:$4 sm:$0xff]  }
 0x26e   :  { %v896_v26 = vpop.f32.mrb[4].mxu0 }
 0x26f   :  { %v2458_v27 = vadd.f32 %v896_v26, %v494_v24  ;;  %v898_v28 = vpop.f32.mrb[5].mxu0  ;;  %v2728_v24 = vld [vmem:[#allocation8 + $0x188] ss:$16 sps:$4 sm:$0xff]  }
 0x270   :  { %v2459_v29 = vadd.f32 %v898_v28, %v498_v25  ;;  %v900_v30 = vpop.f32.mrb[6].mxu0  ;;  %v2736_v25 = vld [vmem:[#allocation8 + $0x1ac] ss:$16 sps:$4 sm:$0xff]   ;;  %v2734_v26 = vld [vmem:[#allocation8 + $0x1a8] ss:$16 sps:$4 sm:$0xff]  }
 0x271   :  { %v903_v32 = vmax.f32 %v2458_v27, 0.0  ;;  %v901_v33 = vpop.f32.mrb[7].mxu0  ;;  %v2252_v27 = vld [vmem:[%s3191_s8] ss:$0 sm:$0xff] }
 0x272   :  { %v904_v34 = vmax.f32 %v2459_v29, 0.0 }
 0x273   :  { %v905_v37 = vpack.c.bf16 %v903_v32, %v903_v32 }
 0x274   :  { %v906_v35 = vpack.c.bf16 %v904_v34, %v904_v34 }
 0x276   :  { %1074 = vmatprep.mubr.bf16.mxu1 %v906_v35  ;;  %v2653_v35 = vld [vmem:[#allocation8] ss:$16 sps:$4 sm:$0xff]  }
 0x277   :  { %1075 = vmatmul.mubr.bf16.vlgmr.msra.gmra.mrb[4].mxu1 %v905_v37  ;;  %v2661_v37 = vld [vmem:[#allocation8 + $0x24] ss:$16 sps:$4 sm:$0xff]  }
 0x278   :  { %2439 = vmatpush3.bf16.msra.mxu1 %v2639_v36  ;;  %2454 = vmatprep.mubr.msk.bf16.mxu1 %vm2934_vm0, %v2933_v22 }
 0x279   :  { %2440 = vmatprep.subr.bf16.mxu1 %v2933_v22 }
 0x27c   :  { %2441 = vmatpush3.bf16.msra.mxu1 %v2640_v38  ;;  %v2659_v38 = vld [vmem:[#allocation8 + $0x20] ss:$16 sps:$4 sm:$0xff]  }
 0x27d   :  { %2442 = vmatprep.subr.bf16.mxu1 %v2933_v22 }
 0x280   :  { %2443 = vmatpush3.bf16.msra.mxu1 %v2641_v39  ;;  %v2667_v39 = vld [vmem:[#allocation8 + $0x44] ss:$16 sps:$4 sm:$0xff]  }
 0x281   :  { %2444 = vmatprep.subr.bf16.mxu1 %v2933_v22 }
 0x284   :  { %2445 = vmatpush3.bf16.msra.mxu1 %v2642_v40  ;;  %v2665_v40 = vld [vmem:[#allocation8 + $0x40] ss:$16 sps:$4 sm:$0xff]  }
 0x285   :  { %2446 = vmatprep.subr.bf16.mxu1 %v2933_v22 }
 0x288   :  { %2447 = vmatpush3.bf16.msra.mxu1 %v2643_v41  ;;  %v2673_v41 = vld [vmem:[#allocation8 + $0x64] ss:$16 sps:$4 sm:$0xff]  }
 0x289   :  { %2448 = vmatprep.subr.bf16.mxu1 %v2933_v22 }
 0x28c   :  { %2449 = vmatpush3.bf16.msra.mxu1 %v2644_v42  ;;  %v2671_v42 = vld [vmem:[#allocation8 + $0x60] ss:$16 sps:$4 sm:$0xff]  }
 0x28d   :  { %2450 = vmatprep.subr.bf16.mxu1 %v2933_v22 }
 0x290   :  { %2451 = vmatpush3.bf16.msra.mxu1 %v2645_v43  ;;  %v2679_v43 = vld [vmem:[#allocation8 + $0x84] ss:$16 sps:$4 sm:$0xff]  }
 0x291   :  { %2452 = vmatprep.subr.bf16.mxu1 %v2933_v22  ;;  %v2722_v22 = vld [vmem:[#allocation8 + $0x168] ss:$16 sps:$4 sm:$0xff]  }
 0x294   :  { %2453 = vmatpush3.bf16.msra.mxu1 %v2646_v44  ;;  %v2677_v44 = vld [vmem:[#allocation8 + $0x80] ss:$16 sps:$4 sm:$0xff]  }
 0x295   :  { %1237 = vmatprep.subr.bf16.mxu1 %v2649_v45  ;;  %v2685_v45 = vld [vmem:[#allocation8 + $0xa4] ss:$16 sps:$4 sm:$0xff]  }
 0x34a   :  { %v2379_v46 = vpop.f32.mrb[4].mxu1 }
 0x34b   :  { %v2380_v48 = vpop.f32.mrb[5].mxu1 }
 0x34c   :  { %v2381_v49 = vadd.f32 %v2380_v48, %v2379_v46  ;;  %v2382_v50 = vpop.f32.mrb[6].mxu1  ;;  %v2683_v46 = vld [vmem:[#allocation8 + $0xa0] ss:$16 sps:$4 sm:$0xff]  }
 0x34d   :  { %v2383_v51 = vpop.f32.mrb[7].mxu1  ;;  %v2689_v48 = vld [vmem:[#allocation8 + $0xc0] ss:$16 sps:$4 sm:$0xff]  }
 0x34e   :  { %v1077_v52 = vadd.f32 %v2381_v49, %v2235_v47  ;;  %v2691_v47 = vld [vmem:[#allocation8 + $0xc4] ss:$16 sps:$4 sm:$0xff]   ;;  %v2695_v50 = vld [vmem:[#allocation8 + $0xe0] ss:$16 sps:$4 sm:$0xff]  }
 0x34f   :  { %v2697_v49 = vld [vmem:[#allocation8 + $0xe4] ss:$16 sps:$4 sm:$0xff]  }
 0x350   :  { %v1082_v53 = vmax.f32 %v1077_v52, 0.0  ;;  %v2703_v51 = vld [vmem:[#allocation8 + $0x104] ss:$16 sps:$4 sm:$0xff]   ;;  %v2701_v52 = vld [vmem:[#allocation8 + $0x100] ss:$16 sps:$4 sm:$0xff]  }
 0x352   :  { %v1083_v55 = vpack.c.bf16 %v1082_v53, %v1082_v53  ;;  %v2709_v53 = vld [vmem:[#allocation8 + $0x124] ss:$16 sps:$4 sm:$0xff]  }
 0x354   :  { %2455 = vmatmul.mubr.bf16.vlgmr.msra.gmra.mrb[8].mxu1 %v1083_v55  ;;  %v2715_v55 = vld [vmem:[#allocation8 + $0x144] ss:$16 sps:$4 sm:$0xff]  }
 0x355   :  { %1238 = vmatpush1.bf16.msra.mxu1 %v2647_v54  ;;  %1269 = vmatprep.mubr.bf16.mxu1 %v2932_v0  ;;  %v2670_v0 = vld [vmem:[#allocation8 + $0x4c] ss:$16 sps:$4 sm:$0xff]   ;;  %v2707_v54 = vld [vmem:[#allocation8 + $0x120] ss:$16 sps:$4 sm:$0xff]  }
 0x356   :  { %1239 = vmatprep.subr.bf16.mxu1 %v2652_v56  ;;  %1733 = vmatprep.subr.bf16.mxu0 %v2670_v0  ;;  %v2713_v56 = vld [vmem:[#allocation8 + $0x140] ss:$16 sps:$4 sm:$0xff]   ;;  %v2739_v0 = vld [vmem:[#allocation8 + $0x1c4] ss:$16 sps:$4 sm:$0xff]  }
 0x357   :  { %1734 = vmatpush1.bf16.msra.mxu0 %v2668_v63  ;;  %v2742_v63 = vld [vmem:[#allocation8 + $0x1cc] ss:$16 sps:$4 sm:$0xff]  }
 0x358   :  { %1735 = vmatprep.subr.bf16.mxu0 %v2676_v1  ;;  %v2737_v1 = vld [vmem:[#allocation8 + $0x1c0] ss:$16 sps:$4 sm:$0xff]  }
 0x359   :  { %1240 = vmatpush1.bf16.msra.mxu1 %v2650_v57  ;;  %v2721_v57 = vld [vmem:[#allocation8 + $0x164] ss:$16 sps:$4 sm:$0xff]  }
 0x35a   :  { %1688 = vmatprep.subr.bf16.mxu1 %v2655_v58  ;;  %v2719_v58 = vld [vmem:[#allocation8 + $0x160] ss:$16 sps:$4 sm:$0xff]  }
 0x35b   :  { %1736 = vmatpush1.bf16.msra.mxu0 %v2674_v2  ;;  %v2740_v2 = vld [vmem:[#allocation8 + $0x1c8] ss:$16 sps:$4 sm:$0xff]  }
 0x35c   :  { %1737 = vmatprep.subr.bf16.mxu0 %v2682_v3  ;;  %v2745_v3 = vld [vmem:[#allocation8 + $0x1e4] ss:$16 sps:$4 sm:$0xff]  }
 0x35f   :  { %1738 = vmatpush1.bf16.msra.mxu0 %v2680_v5  ;;  %v2748_v5 = vld [vmem:[#allocation8 + $0x1ec] ss:$16 sps:$4 sm:$0xff]  }
 0x360   :  { %1739 = vmatprep.subr.bf16.mxu0 %v2688_v6  ;;  %v2743_v6 = vld [vmem:[#allocation8 + $0x1e0] ss:$16 sps:$4 sm:$0xff]  }
 0x363   :  { %1740 = vmatpush1.bf16.msra.mxu0 %v2686_v7  ;;  %v2746_v7 = vld [vmem:[#allocation8 + $0x1e8] ss:$16 sps:$4 sm:$0xff]  }
 0x364   :  { %1741 = vmatprep.subr.bf16.mxu0 %v2694_v8  ;;  %v2749_v8 = vld [vmem:[#allocation10 + $0x40] sm:$0xff]  }
 0x367   :  { %1742 = vmatpush1.bf16.msra.mxu0 %v2692_v9  ;;  %v1201_v9 = vld [vmem:[%s3193_s10] sm:$0x3] }
 0x368   :  { %1743 = vmatprep.subr.bf16.mxu0 %v2700_v10  ;;  %v1206_v10 = vrot.slane %v1201_v9, %v3084_v18 }
 0x36b   :  { %1744 = vmatpush1.bf16.msra.mxu0 %v2698_v11  ;;  %v1210_v11 = vrot.slane %v1201_v9, %v3092_v20  ;;  %v2777_v9 = vld [vmem:[#allocation10 + $0xf0] sm:$0xff]  }
 0x36c   :  { %1745 = vmatprep.subr.bf16.mxu0 %v2706_v12 }
 0x36f   :  { %1746 = vmatpush1.bf16.msra.mxu0 %v2704_v13 }
 0x370   :  { %1747 = vmatprep.subr.bf16.mxu0 %v2712_v14 }
 0x373   :  { %1748 = vmatpush1.bf16.msra.mxu0 %v2710_v15 }
 0x374   :  { %1749 = vmatprep.subr.bf16.mxu0 %v2718_v16 }
 0x377   :  { %1750 = vmatpush1.bf16.msra.mxu0 %v2716_v21 }
 0x378   :  { %1751 = vmatprep.subr.bf16.mxu0 %v2724_v19 }
 0x37b   :  { %1752 = vmatpush1.bf16.msra.mxu0 %v2722_v22 }
 0x37c   :  { %1753 = vmatprep.subr.bf16.mxu0 %v2730_v23 }
 0x37f   :  { %1754 = vmatpush1.bf16.msra.mxu0 %v2728_v24  ;;  %v2750_v24 = vld [vmem:[#allocation10] sm:$0xff]  }
 0x380   :  { %1755 = vmatprep.subr.bf16.mxu0 %v2736_v25 }
 0x383   :  { %1756 = vmatpush1.bf16.msra.mxu0 %v2734_v26  ;;  %v2751_v26 = vld [vmem:[#allocation10 + $0x48] sm:$0xff]  }
 0x384   :  { %1757 = vmatprep.subr.bf16.mxu0 %v2742_v63  ;;  %v2770_v63 = vld [vmem:[#allocation10 + $0x90] sm:$0xff]  }
 0x387   :  { %1758 = vmatpush1.bf16.msra.mxu0 %v2740_v2  ;;  %v2772_v2 = vld [vmem:[#allocation10 + $0x98] sm:$0xff]  }
 0x388   :  { %1759 = vmatprep.subr.bf16.mxu0 %v2748_v5  ;;  %v2774_v5 = vld [vmem:[#allocation10 + $0xa0] sm:$0xff]  }
 0x38b   :  { %1760 = vmatpush1.bf16.msra.mxu0 %v2746_v7  ;;  %v2776_v7 = vld [vmem:[#allocation10 + $0xa8] sm:$0xff]  }
 0x427   :  { %v1189_v28 = vpop.f32.mrb[8].mxu1 }
 0x428   :  { %v1190_v29 = vadd.f32 %v2252_v27, %v1189_v28  ;;  %v2456_v30 = vpop.f32.mrb[9].mxu1  ;;  %v2752_v27 = vld [vmem:[#allocation10 + $0x8] sm:$0xff]   ;;  %v2753_v28 = vld [vmem:[#allocation10 + $0x50] sm:$0xff]  }
 0x429   :  { %v1192_v32 = vpop.f32.mrb[10].mxu1  ;;  %v2755_v30 = vld [vmem:[#allocation10 + $0x58] sm:$0xff]  }
 0x42a   :  { %v1195_v33 = vmax.f32 %v1190_v29, 0.0  ;;  %v2457_v34 = vpop.f32.mrb[11].mxu1  ;;  %v2754_v29 = vld [vmem:[#allocation10 + $0x10] sm:$0xff]   ;;  %v2756_v32 = vld [vmem:[#allocation10 + $0x18] sm:$0xff]  }
 0x42b   :  { %v2758_v34 = vld [vmem:[#allocation10 + $0x20] sm:$0xff]  }
 0x42c   :  { %v1196_v36 = vpack.c.bf16 %v1195_v33, %v1195_v33  ;;  %v2757_v33 = vld [vmem:[#allocation10 + $0x60] sm:$0xff]  }
 0x42e   :  { %2265 = vmatmul.mubr.msk.bf16.vlgmr.msra.gmra.mrb[12].mxu1 %vm1233_vm1, %v1196_v36  ;;  %v2760_v36 = vld [vmem:[#allocation10 + $0x28] sm:$0xff]  }
 0x42f   :  { %1689 = vmatpush1.bf16.msra.mxu1 %v2653_v35  ;;  %v2759_v35 = vld [vmem:[#allocation10 + $0x68] sm:$0xff]  }
 0x430   :  { %1690 = vmatprep.subr.bf16.mxu1 %v2661_v37  ;;  %v2761_v37 = vld [vmem:[#allocation10 + $0x70] sm:$0xff]  }
 0x433   :  { %1691 = vmatpush1.bf16.msra.mxu1 %v2659_v38  ;;  %v2762_v38 = vld [vmem:[#allocation10 + $0x30] sm:$0xff]  }
 0x434   :  { %1692 = vmatprep.subr.bf16.mxu1 %v2667_v39  ;;  %v2763_v39 = vld [vmem:[#allocation10 + $0x78] sm:$0xff]  }
 0x437   :  { %1693 = vmatpush1.bf16.msra.mxu1 %v2665_v40  ;;  %v2764_v40 = vld [vmem:[#allocation10 + $0x38] sm:$0xff]  }
 0x438   :  { %1694 = vmatprep.subr.bf16.mxu1 %v2673_v41  ;;  %v2765_v41 = vld [vmem:[#allocation10 + $0xc0] sm:$0xff]  }
 0x43b   :  { %1695 = vmatpush1.bf16.msra.mxu1 %v2671_v42  ;;  %v1346_v42 = vld [vmem:[%s3195_s12] sm:$0xf] }
 0x43c   :  { %1696 = vmatprep.subr.bf16.mxu1 %v2679_v43  ;;  %v1351_v43 = vrot.slane %v1346_v42, %v3084_v18 }
 0x43f   :  { %1697 = vmatpush1.bf16.msra.mxu1 %v2677_v44  ;;  %v1355_v44 = vrot.slane %v1346_v42, %v3092_v20 }
 0x440   :  { %1698 = vmatprep.subr.bf16.mxu1 %v2685_v45  ;;  %v1363_v45 = vrot.slane %v1346_v42, %v169_v31  ;;  %v2768_v31 = vld [vmem:[#allocation10 + $0x88] sm:$0xff]  }
 0x443   :  { %1699 = vmatpush1.bf16.msra.mxu1 %v2683_v46 }
 0x444   :  { %1700 = vmatprep.subr.bf16.mxu1 %v2691_v47 }
 0x447   :  { %1701 = vmatpush1.bf16.msra.mxu1 %v2689_v48 }
 0x448   :  { %1702 = vmatprep.subr.bf16.mxu1 %v2697_v49 }
 0x44b   :  { %1703 = vmatpush1.bf16.msra.mxu1 %v2695_v50 }
 0x44c   :  { %1704 = vmatprep.subr.bf16.mxu1 %v2703_v51 }
 0x44f   :  { %1705 = vmatpush1.bf16.msra.mxu1 %v2701_v52 }
 0x450   :  { %1706 = vmatprep.subr.bf16.mxu1 %v2709_v53 }
 0x453   :  { %1707 = vmatpush1.bf16.msra.mxu1 %v2707_v54 }
 0x454   :  { %1708 = vmatprep.subr.bf16.mxu1 %v2715_v55 }
 0x457   :  { %1709 = vmatpush1.bf16.msra.mxu1 %v2713_v56 }
 0x458   :  { %1710 = vmatprep.subr.bf16.mxu1 %v2721_v57 }
 0x45b   :  { %1711 = vmatpush1.bf16.msra.mxu1 %v2719_v58 }
 0x45c   :  { %1712 = vmatprep.subr.bf16.mxu1 %v2727_v59 }
 0x45f   :  { %1713 = vmatpush1.bf16.msra.mxu1 %v2725_v60  ;;  %v2766_v60 = vld [vmem:[#allocation10 + $0x80] sm:$0xff]  }
 0x460   :  { %1714 = vmatprep.subr.bf16.mxu1 %v2733_v61  ;;  %v2767_v61 = vld [vmem:[#allocation10 + $0xc8] sm:$0xff]  }
 0x463   :  { %1715 = vmatpush1.bf16.msra.mxu1 %v2731_v62 }
 0x464   :  { %1716 = vmatprep.subr.bf16.mxu1 %v2739_v0  ;;  %v2769_v0 = vld [vmem:[#allocation10 + $0xd0] sm:$0xff]  }
 0x467   :  { %1717 = vmatpush1.bf16.msra.mxu1 %v2737_v1  ;;  %v2771_v1 = vld [vmem:[#allocation10 + $0xd8] sm:$0xff]  }
 0x468   :  { %1718 = vmatprep.subr.bf16.mxu1 %v2745_v3  ;;  %v2773_v3 = vld [vmem:[#allocation10 + $0xe0] sm:$0xff]  }
 0x46b   :  { %1719 = vmatpush1.bf16.msra.mxu1 %v2743_v6  ;;  %v2775_v6 = vld [vmem:[#allocation10 + $0xe8] sm:$0xff]  }
 0x46c   :  { %2394 = vmatprep.subr.bf16.mxu1 %v2749_v8  ;;  %v1359_v8 = vrot.slane %v1346_v42, %v165_v4  ;;  %v2330_v4 = vld [vmem:[%s3197_s14] ss:$0 sm:$0xff] }
 0x501   :  { %v1271_v12 = vpop.f32.mrb[12].mxu1 }
 0x502   :  { %v1272_v13 = vadd.f32 %v1271_v12, %v1206_v10  ;;  %v1273_v14 = vpop.f32.mrb[13].mxu1  ;;  %v2778_v10 = vld [vmem:[#allocation10 + $0xb0] sm:$0xff]   ;;  %v2779_v12 = vld [vmem:[#allocation10 + $0xf8] sm:$0xff]  }
 0x503   :  { %v1274_v15 = vadd.f32 %v1273_v14, %v1210_v11  ;;  %v1275_v16 = vpop.f32.mrb[14].mxu1 }
 0x504   :  { %v1278_v21 = vmax.f32 %v1272_v13, 0.0  ;;  %v1276_v19 = vpop.f32.mrb[15].mxu1  ;;  %v2780_v13 = vld [vmem:[#allocation10 + $0xb8] sm:$0xff]  }
 0x505   :  { %v1279_v22 = vmax.f32 %v1274_v15, 0.0 }
 0x506   :  { %v1280_v25 = vpack.c.bf16 %v1278_v21, %v1278_v21 }
 0x507   :  { %v1281_v23 = vpack.c.bf16 %v1279_v22, %v1279_v22 }
 0x509   :  { %1720 = vmatprep.mubr.bf16.mxu1 %v1281_v23  ;;  %1761 = vmatprep.mubr.bf16.mxu0 %v1281_v23 }
 0x50a   :  { %1721 = vmatmul.mubr.bf16.vlgmr.msra.gmra.mrb[16].mxu1 %v1280_v25  ;;  %1762 = vmatmul.mubr.bf16.vlgmr.msra.gmra.mrb[8].mxu0 %v1280_v25 }
 0x50b   :  { %2395 = vmatpush3.bf16.msra.mxu1 %v2750_v24 }
 0x50c   :  { %2396 = vmatprep.subr.bf16.mxu1 %v2751_v26 }
 0x50f   :  { %2397 = vmatpush3.bf16.msra.mxu1 %v2752_v27 }
 0x510   :  { %2398 = vmatprep.subr.bf16.mxu1 %v2753_v28 }
 0x513   :  { %2399 = vmatpush3.bf16.msra.mxu1 %v2754_v29 }
 0x514   :  { %2400 = vmatprep.subr.bf16.mxu1 %v2755_v30 }
 0x517   :  { %2401 = vmatpush3.bf16.msra.mxu1 %v2756_v32 }
 0x518   :  { %2402 = vmatprep.subr.bf16.mxu1 %v2757_v33 }
 0x51b   :  { %2403 = vmatpush3.bf16.msra.mxu1 %v2758_v34 }
 0x51c   :  { %2404 = vmatprep.subr.bf16.mxu1 %v2759_v35 }
 0x51f   :  { %2405 = vmatpush3.bf16.msra.mxu1 %v2760_v36 }
 0x520   :  { %2406 = vmatprep.subr.bf16.mxu1 %v2761_v37 }
 0x523   :  { %2407 = vmatpush3.bf16.msra.mxu1 %v2762_v38 }
 0x524   :  { %2408 = vmatprep.subr.bf16.mxu1 %v2763_v39 }
 0x527   :  { %2409 = vmatpush3.bf16.msra.mxu1 %v2764_v40 }
 0x528   :  { %2416 = vmatprep.subr.bf16.mxu1 %v2765_v41 }
 0x5dd   :  { %v1722_v46 = vpop.f32.mrb[16].mxu1  ;;  %v1763_v47 = vpop.f32.mrb[8].mxu0 }
 0x5de   :  { %v1723_v48 = vadd.f32 %v1722_v46, %v1351_v43  ;;  %v1724_v49 = vpop.f32.mrb[17].mxu1  ;;  %v1765_v50 = vpop.f32.mrb[9].mxu0  ;;  %v1764_v11 = vadd.f32 %v1763_v47, %v1359_v8 }
 0x5df   :  { %v1725_v51 = vadd.f32 %v1724_v49, %v1355_v44  ;;  %v1766_v52 = vadd.f32 %v1765_v50, %v1363_v45  ;;  %v1726_v53 = vpop.f32.mrb[18].mxu1  ;;  %v1767_v54 = vpop.f32.mrb[10].mxu0 }
 0x5e0   :  { %v1770_v55 = vmax.f32 %v1723_v48, 0.0  ;;  %v1727_v56 = vpop.f32.mrb[19].mxu1  ;;  %v1768_v57 = vpop.f32.mrb[11].mxu0  ;;  %v1772_v14 = vmax.f32 %v1764_v11, 0.0 }
 0x5e1   :  { %v1771_v58 = vmax.f32 %v1725_v51, 0.0  ;;  %v1773_v59 = vmax.f32 %v1766_v52, 0.0 }
 0x5e2   :  { %v1774_v20 = vpack.c.bf16 %v1770_v55, %v1770_v55  ;;  %v1776_v15 = vpack.c.bf16 %v1772_v14, %v1772_v14 }
 0x5e3   :  { %v1775_v18 = vpack.c.bf16 %v1771_v58, %v1771_v58  ;;  %v1777_v62 = vpack.c.bf16 %v1773_v59, %v1773_v59 }
 0x5e5   :  { %2073 = vmatprep.mubr.bf16.mxu1 %v1775_v18 }
 0x5e6   :  { %2074 = vmatmul.mubr.bf16.vlgmr.msra.gmra.mrb[20].mxu1 %v1774_v20 }
 0x5e7   :  { %2417 = vmatpush3.bf16.msra.mxu1 %v2766_v60  ;;  %2113 = vmatprep.mubr.bf16.mxu1 %v1777_v62 }
 0x5e8   :  { %2418 = vmatprep.subr.bf16.mxu1 %v2767_v61 }
 0x5eb   :  { %2419 = vmatpush3.bf16.msra.mxu1 %v2768_v31 }
 0x5ec   :  { %2420 = vmatprep.subr.bf16.mxu1 %v2769_v0 }
 0x5ef   :  { %2421 = vmatpush3.bf16.msra.mxu1 %v2770_v63 }
 0x5f0   :  { %2422 = vmatprep.subr.bf16.mxu1 %v2771_v1 }
 0x5f3   :  { %2423 = vmatpush3.bf16.msra.mxu1 %v2772_v2 }
 0x5f4   :  { %2424 = vmatprep.subr.bf16.mxu1 %v2773_v3 }
 0x5f7   :  { %2425 = vmatpush3.bf16.msra.mxu1 %v2774_v5 }
 0x5f8   :  { %2426 = vmatprep.subr.bf16.mxu1 %v2775_v6 }
 0x5fb   :  { %2427 = vmatpush3.bf16.msra.mxu1 %v2776_v7 }
 0x5fc   :  { %2428 = vmatprep.subr.bf16.mxu1 %v2777_v9 }
 0x5ff   :  { %2429 = vmatpush3.bf16.msra.mxu1 %v2778_v10 }
 0x600   :  { %2430 = vmatprep.subr.bf16.mxu1 %v2779_v12 }
 0x603   :  { %2431 = vmatpush3.bf16.msra.mxu1 %v2780_v13 }
 0x606   :  { %2114 = vmatmul.mubr.bf16.vlgmr.msra.gmra.mrb[24].mxu1 %v1776_v15 }
 0x6b9   :  { %v2410_v16 = vpop.f32.mrb[20].mxu1 }
 0x6ba   :  { %v2411_v21 = vpop.f32.mrb[21].mxu1 }
 0x6bb   :  { %v2412_v19 = vadd.f32 %v2411_v21, %v2410_v16  ;;  %v2413_v22 = vpop.f32.mrb[22].mxu1 }
 0x6bc   :  { %v2414_v17 = vpop.f32.mrb[23].mxu1 }
 0x6bd   :  { %v2076_v25 = vadd.f32 %v2412_v19, %v2330_v4 }
 0x6d9   :  { %v2432_v23 = vpop.f32.mrb[24].mxu1 }
 0x6da   :  { %v2433_v24 = vpop.f32.mrb[25].mxu1 }
 0x6db   :  { %v2434_v26 = vadd.f32 %v2433_v24, %v2432_v23  ;;  %v2435_v27 = vpop.f32.mrb[26].mxu1 }
 0x6dc   :  { %v2436_v28 = vpop.f32.mrb[27].mxu1 }
 0x6dd   :  { %v2116_v29 = vadd.f32 %v2434_v26, %v2076_v25 }
 0x6df   :  { %2121 = vst [vmem:[#allocation11] sm:$0xff] %v2116_v29 }
 0x6e0   :  { %2902 = shalt.err (!%p2899_p2)
}
 0x6e1   :  { %s3201_s25 = sld [smem:[#allocation16_spill]] }
 0x6e7   :  { %s2903_s11 = scalar_lea.hbm %s3201_s25, 128 }
 0x6e8   :  { %p2904_p3 = scmp.ne.s32.totalorder %s3201_s25, %s2903_s11  ;;  %p2907_p4 = scmp.lt.u32.totalorder %s2903_s11, %s3201_s25 }
 0x6ea   :  { %p2909_p5 = pnand %p2907_p4, %p2904_p3 }
 0x6ec   :  { %2912 = shalt.err (!%p2909_p5)
}
 0x6ed   :  { %2131 = dma.vmem_to_hbm [thread:$0]  %s2129_s28, 128, %s3201_s25, [#allocation4]  }
 0x6ee   :  { %2919 = dma.done.wait [#allocation4], 128  }
 0x6ef   :  { %2920 = vsyncadd [#allocation4], 4294967168 }
 0x6f0   :  { %2135 = vsyncpa [#allocation3], 1 }
 0x6f1   :  { %2136 = vsyncpa [#allocation6], 1 }
 0x6f2   :  { %2137 = vsyncpa [#allocation9], 1 }
 0x6f3   :  { %2138 = vsyncpa [#allocation4], 1 }

</bundles_post_ra>
